<compile_context>
chip_gen: v7x
topology: tpu7x:2x2x1
jax: 0.10.0
libtpu: 0.0.40
codegen_flags: <defaults>
</compile_context>

<pallas_src>
import jax
import jax.numpy as jnp
import numpy as np
from jax import lax
from jax.experimental import pallas as pl
from jax.experimental.pallas import tpu as pltpu


def _round_up(x, m):
    return (x + m - 1) // m * m


def lstm_seq_kernel(xp_ref, whh_ref, h0_ref, c0_ref, out_ref, cn_ref, h_sc, c_sc):
    t_blk = pl.program_id(1)

    # (Re)initialize the carried state at the first time block of each batch block.
    @pl.when(t_blk == 0)
    def _():
        h_sc[...] = h0_ref[0]
        c_sc[...] = c0_ref[0]

    TT = out_ref.shape[0]      # time steps in this block (static)
    H = h_sc.shape[-1]         # padded hidden dim (multiple of 128)

    def step(tt, carry):
        h, c = carry           # f32 (TB, H), register/value-carried
        # One fused-gate MXU matmul (bf16 operands, f32 accumulate) plus the
        # precomputed bf16 input projection for this step.
        gates = xp_ref[tt].astype(jnp.float32) + jnp.dot(
            h.astype(jnp.bfloat16), whh_ref[...],
            preferred_element_type=jnp.float32)
        # PyTorch gate order i, f, g, o; each slice is 128-lane aligned (H % 128 == 0).
        i = jax.nn.sigmoid(gates[:, 0 * H:1 * H])
        f = jax.nn.sigmoid(gates[:, 1 * H:2 * H])
        g = jnp.tanh(gates[:, 2 * H:3 * H])
        o = jax.nn.sigmoid(gates[:, 3 * H:4 * H])
        c_new = f * c + i * g
        h_new = o * jnp.tanh(c_new)
        out_ref[tt] = h_new.astype(out_ref.dtype)
        return h_new, c_new

    h_fin, c_fin = lax.fori_loop(
        0, TT, step, (h_sc[...], c_sc[...]),
        unroll=True if TT <= 4 else 2)

    # Persist (h, c) for the next time block. c_n's block is resident across the
    # time axis, so this VMEM store only reaches HBM once per batch block.
    h_sc[...] = h_fin
    c_sc[...] = c_fin
    cn_ref[0] = c_fin.astype(cn_ref.dtype)


def encoder_lstm_forward(inputs, hidden, w_ih, w_hh, b_ih, b_hh, *, time_block=None):
    """Pallas implementation of EncoderLSTM.forward(inputs, hidden).

    inputs: (T, B, E) float32 (time-major, batch_first=False)
    hidden: (h0, c0) each (1, B, H) float32
    w_ih:   (4H, E)  PyTorch weight_ih_l0 layout, gate order i,f,g,o
    w_hh:   (4H, H)  PyTorch weight_hh_l0 layout
    b_ih, b_hh: (4H,)
    returns: (lstm_out (T,B,H), (h_n (1,B,H), c_n (1,B,H)))
    """
    h0, c0 = hidden
    T, B, E = inputs.shape
    H = h0.shape[-1]
    f32 = jnp.float32

    # ---- (8,128)-friendly padding ------------------------------------------
    H_pad = _round_up(H, 128)          # lane-aligned gate slices
    B_pad = _round_up(B, 16)           # sublane-aligned rows (bf16 x_proj tile)
    G_pad = 4 * H_pad

    w_ih = w_ih.astype(f32)
    w_hh = w_hh.astype(f32)
    b_ih = b_ih.astype(f32)
    b_hh = b_hh.astype(f32)

    # Fused-gate weights in PyTorch (i,f,g,o) order; each gate padded to H_pad
    # output columns (zero pad => padded hidden units stay inert).
    wih_all = jnp.zeros((E, G_pad), f32)
    whh_all = jnp.zeros((H_pad, G_pad), f32)
    b_all = jnp.zeros((G_pad,), f32)
    for k in range(4):
        src = slice(k * H, (k + 1) * H)
        dst = slice(k * H_pad, k * H_pad + H)
        wih_all = wih_all.at[:, dst].set(w_ih[src, :].T)
        whh_all = whh_all.at[:H, dst].set(w_hh[src, :].T)
        b_all = b_all.at[dst].set(b_ih[src] + b_hh[src])

    # Hoisted input projection: one big data-parallel matmul outside the
    # sequential recurrence (includes the combined bias); streamed in bf16.
    inputs_p = jnp.zeros((T, B_pad, E), f32).at[:, :B, :].set(inputs.astype(f32))
    x_proj = (inputs_p.reshape(T * B_pad, E) @ wih_all + b_all)
    x_proj = x_proj.reshape(T, B_pad, G_pad).astype(jnp.bfloat16)
    whh_bf = whh_all.astype(jnp.bfloat16)

    h0_p = jnp.zeros((1, B_pad, H_pad), f32).at[:, :B, :H].set(h0.astype(f32))
    c0_p = jnp.zeros((1, B_pad, H_pad), f32).at[:, :B, :H].set(c0.astype(f32))

    # ---- VMEM-aware blocking -------------------------------------------------
    try:
        phys_vmem = int(pltpu.get_tpu_info().vmem_capacity_bytes)
    except Exception:
        phys_vmem = 64 << 20                      # conservative (v7x per-core)
    budget = int(phys_vmem * 0.4)                 # headroom for compiler scratch

    # Two-way batch blocking (leading "parallel" axis -> v7x's 2 TensorCores),
    # only when the batch is big enough to matter.
    TB = B_pad
    if B_pad >= 32 and (B_pad // 2) % 16 == 0:
        TB = B_pad // 2

    per_step = 2 * (TB * G_pad * 2 + TB * H_pad * 4)   # dbl-buffered x_proj + out
    fixed = (2 * H_pad * G_pad * 2                     # W_hh (double-buffered)
             + 2 * 2 * TB * H_pad * 4                  # h0, c0
             + 2 * TB * H_pad * 4                      # c_n output
             + 2 * TB * H_pad * 4)                     # h/c scratch
    cap = min(T, time_block if time_block is not None else 128)
    TT = 1
    for tt in range(1, cap + 1):
        if T % tt == 0 and fixed + tt * per_step <= budget:
            TT = tt

    vmem_need = fixed + TT * per_step
    vmem_limit = int(min(phys_vmem - (8 << 20), max(2 * vmem_need, 32 << 20)))

    grid = (B_pad // TB, T // TT)

    grid_spec = pltpu.PrefetchScalarGridSpec(
        num_scalar_prefetch=0,
        grid=grid,
        in_specs=[
            pl.BlockSpec((TT, TB, G_pad), lambda b, t: (t, b, 0)),   # X_proj slab
            pl.BlockSpec((H_pad, G_pad), lambda b, t: (0, 0)),       # W_hh (resident)
            pl.BlockSpec((1, TB, H_pad), lambda b, t: (0, b, 0)),    # h0
            pl.BlockSpec((1, TB, H_pad), lambda b, t: (0, b, 0)),    # c0
        ],
        out_specs=[
            pl.BlockSpec((TT, TB, H_pad), lambda b, t: (t, b, 0)),   # lstm_out slab
            pl.BlockSpec((1, TB, H_pad), lambda b, t: (0, b, 0)),    # c_n
        ],
        scratch_shapes=[
            pltpu.VMEM((TB, H_pad), jnp.float32),                    # carried h
            pltpu.VMEM((TB, H_pad), jnp.float32),                    # carried c
        ],
    )

    out_p, cn_p = pl.pallas_call(
        lstm_seq_kernel,
        out_shape=(
            jax.ShapeDtypeStruct((T, B_pad, H_pad), jnp.float32),
            jax.ShapeDtypeStruct((1, B_pad, H_pad), jnp.float32),
        ),
        grid_spec=grid_spec,
        compiler_params=pltpu.CompilerParams(
            dimension_semantics=("parallel", "arbitrary"),  # time axis sequential
            vmem_limit_bytes=vmem_limit),
    )(x_proj, whh_bf, h0_p, c0_p)

    lstm_out = out_p[:, :B, :H]
    c_n = cn_p[:, :B, :H]
    h_n = lstm_out[T - 1:T]        # h_n is exactly the last output step
    return lstm_out, (h_n, c_n)


def lstm_reference(inputs, hidden, w_ih, w_hh, b_ih, b_hh):
    """Pure-JAX f32 reference matching torch.nn.LSTM (1 layer, unidirectional)."""
    h, c = hidden[0][0], hidden[1][0]   # (B, H)
    H = h.shape[-1]
    outs = []
    for t in range(inputs.shape[0]):
        x = inputs[t]
        gates = x @ w_ih.T + h @ w_hh.T + b_ih + b_hh   # (B, 4H)
        i = jax.nn.sigmoid(gates[:, 0 * H:1 * H])
        f = jax.nn.sigmoid(gates[:, 1 * H:2 * H])
        g = jnp.tanh(gates[:, 2 * H:3 * H])
        o = jax.nn.sigmoid(gates[:, 3 * H:4 * H])
        c = f * c + i * g
        h = o * jnp.tanh(c)
        outs.append(h)
    return jnp.stack(outs, 0), (h[None], c[None])


if __name__ == "__main__":
    T, B, E, H = 8, 2, 16, 32   # seq=8, batch=2, embedding_dim=16, hidden_dim=32

    key = jax.random.PRNGKey(0)
    k_in, k_h, k_c, k_wih, k_whh, k_bih, k_bhh = jax.random.split(key, 7)

    inputs = jax.random.normal(k_in, (T, B, E), dtype=jnp.float32)
    h0 = jax.random.normal(k_h, (1, B, H), dtype=jnp.float32)
    c0 = jax.random.normal(k_c, (1, B, H), dtype=jnp.float32)

    # PyTorch default init is U(-1/sqrt(H), 1/sqrt(H)).
    bound = 1.0 / np.sqrt(H)
    w_ih = jax.random.uniform(k_wih, (4 * H, E), jnp.float32, -bound, bound)
    w_hh = jax.random.uniform(k_whh, (4 * H, H), jnp.float32, -bound, bound)
    b_ih = jax.random.uniform(k_bih, (4 * H,), jnp.float32, -bound, bound)
    b_hh = jax.random.uniform(k_bhh, (4 * H,), jnp.float32, -bound, bound)

    # time_block=4 -> time grid of 2 blocks: exercises the cross-grid-step (h,c)
    # carry and the resident c_n writeback.
    lstm_out, (h_n, c_n) = encoder_lstm_forward(
        inputs, (h0, c0), w_ih, w_hh, b_ih, b_hh, time_block=4)
    jax.block_until_ready((lstm_out, h_n, c_n))

    ref_out, (ref_h, ref_c) = lstm_reference(
        inputs, (h0, c0), w_ih, w_hh, b_ih, b_hh)

    # bf16 weight / x_proj streams (f32 accumulation & state) => looser tolerance
    # than a pure-f32 path.
    np.testing.assert_allclose(np.asarray(lstm_out), np.asarray(ref_out),
                               rtol=2e-2, atol=2e-2)
    np.testing.assert_allclose(np.asarray(h_n), np.asarray(ref_h),
                               rtol=2e-2, atol=2e-2)
    np.testing.assert_allclose(np.asarray(c_n), np.asarray(ref_c),
                               rtol=2e-2, atol=2e-2)

    print("KERNEL_OK")
</pallas_src>

<mosaic_0001>
module attributes {stable_mosaic.version = 11 : i64} {
  func.func @lstm_seq_kernel(%arg0: i32, %arg1: i32, %arg2: memref<4x16x512xbf16, #tpu.memory_space<vmem>>, %arg3: memref<128x512xbf16, #tpu.memory_space<vmem>>, %arg4: memref<1x16x128xf32, #tpu.memory_space<vmem>>, %arg5: memref<1x16x128xf32, #tpu.memory_space<vmem>>, %arg6: memref<4x16x128xf32, #tpu.memory_space<vmem>>, %arg7: memref<1x16x128xf32, #tpu.memory_space<vmem>>, %arg8: memref<16x128xf32, #tpu.memory_space<vmem>>, %arg9: memref<16x128xf32, #tpu.memory_space<vmem>>) attributes {dimension_semantics = [#tpu.dimension_semantics<parallel>, #tpu.dimension_semantics<arbitrary>], iteration_bounds = array<i64: 1, 2>, scalar_prefetch = 0 : i64, scratch_operands = 2 : i64, tpu.core_type = #tpu.core_type<tc>, window_params = [{transform_indices = @transform_0, window_bounds = array<i64: 4, 16, 512>}, {pipeline_mode = #tpu.pipeline_mode<synchronous>, transform_indices = @transform_1, window_bounds = array<i64: 128, 512>}, {transform_indices = @transform_2, window_bounds = array<i64: 1, 16, 128>}, {transform_indices = @transform_3, window_bounds = array<i64: 1, 16, 128>}, {transform_indices = @transform_4, window_bounds = array<i64: 4, 16, 128>}, {transform_indices = @transform_5, window_bounds = array<i64: 1, 16, 128>}]} {
    %c0_i32 = arith.constant 0 : i32
    %0 = arith.cmpi eq, %arg1, %c0_i32 : i32
    %1 = arith.extui %0 : i1 to i32
    %c0_i32_0 = arith.constant 0 : i32
    %2 = arith.cmpi ne, %1, %c0_i32_0 : i32
    scf.if %2 {
      %c0_51 = arith.constant 0 : index
      %c0_52 = arith.constant 0 : index
      %c0_53 = arith.constant 0 : index
      %158 = vector.load %arg4[%c0_51, %c0_52, %c0_53] : memref<1x16x128xf32, #tpu.memory_space<vmem>>, vector<1x16x128xf32>
      %159 = vector.shape_cast %158 : vector<1x16x128xf32> to vector<16x128xf32>
      %c0_54 = arith.constant 0 : index
      %c0_55 = arith.constant 0 : index
      %160 = vector.load %arg8[%c0_54, %c0_55] : memref<16x128xf32, #tpu.memory_space<vmem>>, vector<16x128xf32>
      tpu.vector_store %arg8[%c0_54, %c0_55], %159 {strides = array<i32>} : memref<16x128xf32, #tpu.memory_space<vmem>>, vector<16x128xf32>,
      %c0_56 = arith.constant 0 : index
      %c0_57 = arith.constant 0 : index
      %c0_58 = arith.constant 0 : index
      %161 = vector.load %arg5[%c0_56, %c0_57, %c0_58] : memref<1x16x128xf32, #tpu.memory_space<vmem>>, vector<1x16x128xf32>
      %162 = vector.shape_cast %161 : vector<1x16x128xf32> to vector<16x128xf32>
      %c0_59 = arith.constant 0 : index
      %c0_60 = arith.constant 0 : index
      %163 = vector.load %arg9[%c0_59, %c0_60] : memref<16x128xf32, #tpu.memory_space<vmem>>, vector<16x128xf32>
      tpu.vector_store %arg9[%c0_59, %c0_60], %162 {strides = array<i32>} : memref<16x128xf32, #tpu.memory_space<vmem>>, vector<16x128xf32>,
    } else {
    }
    %c0 = arith.constant 0 : index
    %c0_1 = arith.constant 0 : index
    %3 = vector.load %arg8[%c0, %c0_1] : memref<16x128xf32, #tpu.memory_space<vmem>>, vector<16x128xf32>
    %c0_2 = arith.constant 0 : index
    %c0_3 = arith.constant 0 : index
    %4 = vector.load %arg9[%c0_2, %c0_3] : memref<16x128xf32, #tpu.memory_space<vmem>>, vector<16x128xf32>
    %c0_i32_4 = arith.constant 0 : i32
    %5 = arith.index_cast %c0_i32_4 : i32 to index
    %c0_5 = arith.constant 0 : index
    %c0_6 = arith.constant 0 : index
    %6 = vector.load %arg2[%5, %c0_5, %c0_6] : memref<4x16x512xbf16, #tpu.memory_space<vmem>>, vector<1x16x512xbf16>
    %7 = vector.shape_cast %6 : vector<1x16x512xbf16> to vector<16x512xbf16>
    %8 = arith.extf %7 : vector<16x512xbf16> to vector<16x512xf32>
    %9 = arith.truncf %3 : vector<16x128xf32> to vector<16x128xbf16>
    %c0_7 = arith.constant 0 : index
    %c0_8 = arith.constant 0 : index
    %10 = vector.load %arg3[%c0_7, %c0_8] : memref<128x512xbf16, #tpu.memory_space<vmem>>, vector<128x512xbf16>
    %cst = arith.constant dense<0.000000e+00> : vector<16x512xf32>
    %11 = tpu.matmul %9, %10, %cst {dimension_numbers = #tpu.dot_dimension_numbers<[1], [0], [0], [1], [0, 0, 1, 1], [], []>} : vector<16x128xbf16>, vector<128x512xbf16>, vector<16x512xf32> -> vector<16x512xf32>
    %12 = arith.addf %8, %11 : vector<16x512xf32>
    %13 = vector.extract_strided_slice %12 {offsets = [0, 0], sizes = [16, 128], strides = [1, 1]} : vector<16x512xf32> to vector<16x128xf32>
    %14 = arith.negf %13 : vector<16x128xf32>
    %15 = math.exp %14 : vector<16x128xf32>
    %cst_9 = arith.constant 1.000000e+00 : f32
    %16 = vector.broadcast %cst_9 : f32 to vector<16x128xf32>
    %17 = arith.addf %16, %15 : vector<16x128xf32>
    %18 = arith.divf %16, %17 : vector<16x128xf32>
    %19 = vector.extract_strided_slice %12 {offsets = [0, 128], sizes = [16, 128], strides = [1, 1]} : vector<16x512xf32> to vector<16x128xf32>
    %20 = arith.negf %19 : vector<16x128xf32>
    %21 = math.exp %20 : vector<16x128xf32>
    %cst_10 = arith.constant 1.000000e+00 : f32
    %22 = vector.broadcast %cst_10 : f32 to vector<16x128xf32>
    %23 = arith.addf %22, %21 : vector<16x128xf32>
    %24 = arith.divf %22, %23 : vector<16x128xf32>
    %25 = vector.extract_strided_slice %12 {offsets = [0, 256], sizes = [16, 128], strides = [1, 1]} : vector<16x512xf32> to vector<16x128xf32>
    %26 = math.tanh %25 : vector<16x128xf32>
    %27 = vector.extract_strided_slice %12 {offsets = [0, 384], sizes = [16, 128], strides = [1, 1]} : vector<16x512xf32> to vector<16x128xf32>
    %28 = arith.negf %27 : vector<16x128xf32>
    %29 = math.exp %28 : vector<16x128xf32>
    %cst_11 = arith.constant 1.000000e+00 : f32
    %30 = vector.broadcast %cst_11 : f32 to vector<16x128xf32>
    %31 = arith.addf %30, %29 : vector<16x128xf32>
    %32 = arith.divf %30, %31 : vector<16x128xf32>
    %33 = arith.mulf %24, %4 : vector<16x128xf32>
    %34 = arith.mulf %18, %26 : vector<16x128xf32>
    %35 = arith.addf %33, %34 : vector<16x128xf32>
    %36 = math.tanh %35 : vector<16x128xf32>
    %37 = arith.mulf %32, %36 : vector<16x128xf32>
    %38 = arith.index_cast %c0_i32_4 : i32 to index
    %c0_12 = arith.constant 0 : index
    %c0_13 = arith.constant 0 : index
    %39 = vector.load %arg6[%38, %c0_12, %c0_13] : memref<4x16x128xf32, #tpu.memory_space<vmem>>, vector<1x16x128xf32>
    %40 = vector.shape_cast %39 : vector<1x16x128xf32> to vector<16x128xf32>
    %41 = vector.shape_cast %37 : vector<16x128xf32> to vector<1x16x128xf32>
    tpu.vector_store %arg6[%38, %c0_12, %c0_13], %41 {strides = array<i32>} : memref<4x16x128xf32, #tpu.memory_space<vmem>>, vector<1x16x128xf32>,
    %c1_i32 = arith.constant 1 : i32
    %42 = arith.index_cast %c1_i32 : i32 to index
    %c0_14 = arith.constant 0 : index
    %c0_15 = arith.constant 0 : index
    %43 = vector.load %arg2[%42, %c0_14, %c0_15] : memref<4x16x512xbf16, #tpu.memory_space<vmem>>, vector<1x16x512xbf16>
    %44 = vector.shape_cast %43 : vector<1x16x512xbf16> to vector<16x512xbf16>
    %45 = arith.extf %44 : vector<16x512xbf16> to vector<16x512xf32>
    %46 = arith.truncf %37 : vector<16x128xf32> to vector<16x128xbf16>
    %c0_16 = arith.constant 0 : index
    %c0_17 = arith.constant 0 : index
    %47 = vector.load %arg3[%c0_16, %c0_17] : memref<128x512xbf16, #tpu.memory_space<vmem>>, vector<128x512xbf16>
    %cst_18 = arith.constant dense<0.000000e+00> : vector<16x512xf32>
    %48 = tpu.matmul %46, %47, %cst_18 {dimension_numbers = #tpu.dot_dimension_numbers<[1], [0], [0], [1], [0, 0, 1, 1], [], []>} : vector<16x128xbf16>, vector<128x512xbf16>, vector<16x512xf32> -> vector<16x512xf32>
    %49 = arith.addf %45, %48 : vector<16x512xf32>
    %50 = vector.extract_strided_slice %49 {offsets = [0, 0], sizes = [16, 128], strides = [1, 1]} : vector<16x512xf32> to vector<16x128xf32>
    %51 = arith.negf %50 : vector<16x128xf32>
    %52 = math.exp %51 : vector<16x128xf32>
    %cst_19 = arith.constant 1.000000e+00 : f32
    %53 = vector.broadcast %cst_19 : f32 to vector<16x128xf32>
    %54 = arith.addf %53, %52 : vector<16x128xf32>
    %55 = arith.divf %53, %54 : vector<16x128xf32>
    %56 = vector.extract_strided_slice %49 {offsets = [0, 128], sizes = [16, 128], strides = [1, 1]} : vector<16x512xf32> to vector<16x128xf32>
    %57 = arith.negf %56 : vector<16x128xf32>
    %58 = math.exp %57 : vector<16x128xf32>
    %cst_20 = arith.constant 1.000000e+00 : f32
    %59 = vector.broadcast %cst_20 : f32 to vector<16x128xf32>
    %60 = arith.addf %59, %58 : vector<16x128xf32>
    %61 = arith.divf %59, %60 : vector<16x128xf32>
    %62 = vector.extract_strided_slice %49 {offsets = [0, 256], sizes = [16, 128], strides = [1, 1]} : vector<16x512xf32> to vector<16x128xf32>
    %63 = math.tanh %62 : vector<16x128xf32>
    %64 = vector.extract_strided_slice %49 {offsets = [0, 384], sizes = [16, 128], strides = [1, 1]} : vector<16x512xf32> to vector<16x128xf32>
    %65 = arith.negf %64 : vector<16x128xf32>
    %66 = math.exp %65 : vector<16x128xf32>
    %cst_21 = arith.constant 1.000000e+00 : f32
    %67 = vector.broadcast %cst_21 : f32 to vector<16x128xf32>
    %68 = arith.addf %67, %66 : vector<16x128xf32>
    %69 = arith.divf %67, %68 : vector<16x128xf32>
    %70 = arith.mulf %61, %35 : vector<16x128xf32>
    %71 = arith.mulf %55, %63 : vector<16x128xf32>
    %72 = arith.addf %70, %71 : vector<16x128xf32>
    %73 = math.tanh %72 : vector<16x128xf32>
    %74 = arith.mulf %69, %73 : vector<16x128xf32>
    %75 = arith.index_cast %c1_i32 : i32 to index
    %c0_22 = arith.constant 0 : index
    %c0_23 = arith.constant 0 : index
    %76 = vector.load %arg6[%75, %c0_22, %c0_23] : memref<4x16x128xf32, #tpu.memory_space<vmem>>, vector<1x16x128xf32>
    %77 = vector.shape_cast %76 : vector<1x16x128xf32> to vector<16x128xf32>
    %78 = vector.shape_cast %74 : vector<16x128xf32> to vector<1x16x128xf32>
    tpu.vector_store %arg6[%75, %c0_22, %c0_23], %78 {strides = array<i32>} : memref<4x16x128xf32, #tpu.memory_space<vmem>>, vector<1x16x128xf32>,
    %c2_i32 = arith.constant 2 : i32
    %79 = arith.index_cast %c2_i32 : i32 to index
    %c0_24 = arith.constant 0 : index
    %c0_25 = arith.constant 0 : index
    %80 = vector.load %arg2[%79, %c0_24, %c0_25] : memref<4x16x512xbf16, #tpu.memory_space<vmem>>, vector<1x16x512xbf16>
    %81 = vector.shape_cast %80 : vector<1x16x512xbf16> to vector<16x512xbf16>
    %82 = arith.extf %81 : vector<16x512xbf16> to vector<16x512xf32>
    %83 = arith.truncf %74 : vector<16x128xf32> to vector<16x128xbf16>
    %c0_26 = arith.constant 0 : index
    %c0_27 = arith.constant 0 : index
    %84 = vector.load %arg3[%c0_26, %c0_27] : memref<128x512xbf16, #tpu.memory_space<vmem>>, vector<128x512xbf16>
    %cst_28 = arith.constant dense<0.000000e+00> : vector<16x512xf32>
    %85 = tpu.matmul %83, %84, %cst_28 {dimension_numbers = #tpu.dot_dimension_numbers<[1], [0], [0], [1], [0, 0, 1, 1], [], []>} : vector<16x128xbf16>, vector<128x512xbf16>, vector<16x512xf32> -> vector<16x512xf32>
    %86 = arith.addf %82, %85 : vector<16x512xf32>
    %87 = vector.extract_strided_slice %86 {offsets = [0, 0], sizes = [16, 128], strides = [1, 1]} : vector<16x512xf32> to vector<16x128xf32>
    %88 = arith.negf %87 : vector<16x128xf32>
    %89 = math.exp %88 : vector<16x128xf32>
    %cst_29 = arith.constant 1.000000e+00 : f32
    %90 = vector.broadcast %cst_29 : f32 to vector<16x128xf32>
    %91 = arith.addf %90, %89 : vector<16x128xf32>
    %92 = arith.divf %90, %91 : vector<16x128xf32>
    %93 = vector.extract_strided_slice %86 {offsets = [0, 128], sizes = [16, 128], strides = [1, 1]} : vector<16x512xf32> to vector<16x128xf32>
    %94 = arith.negf %93 : vector<16x128xf32>
    %95 = math.exp %94 : vector<16x128xf32>
    %cst_30 = arith.constant 1.000000e+00 : f32
    %96 = vector.broadcast %cst_30 : f32 to vector<16x128xf32>
    %97 = arith.addf %96, %95 : vector<16x128xf32>
    %98 = arith.divf %96, %97 : vector<16x128xf32>
    %99 = vector.extract_strided_slice %86 {offsets = [0, 256], sizes = [16, 128], strides = [1, 1]} : vector<16x512xf32> to vector<16x128xf32>
    %100 = math.tanh %99 : vector<16x128xf32>
    %101 = vector.extract_strided_slice %86 {offsets = [0, 384], sizes = [16, 128], strides = [1, 1]} : vector<16x512xf32> to vector<16x128xf32>
    %102 = arith.negf %101 : vector<16x128xf32>
    %103 = math.exp %102 : vector<16x128xf32>
    %cst_31 = arith.constant 1.000000e+00 : f32
    %104 = vector.broadcast %cst_31 : f32 to vector<16x128xf32>
    %105 = arith.addf %104, %103 : vector<16x128xf32>
    %106 = arith.divf %104, %105 : vector<16x128xf32>
    %107 = arith.mulf %98, %72 : vector<16x128xf32>
    %108 = arith.mulf %92, %100 : vector<16x128xf32>
    %109 = arith.addf %107, %108 : vector<16x128xf32>
    %110 = math.tanh %109 : vector<16x128xf32>
    %111 = arith.mulf %106, %110 : vector<16x128xf32>
    %112 = arith.index_cast %c2_i32 : i32 to index
    %c0_32 = arith.constant 0 : index
    %c0_33 = arith.constant 0 : index
    %113 = vector.load %arg6[%112, %c0_32, %c0_33] : memref<4x16x128xf32, #tpu.memory_space<vmem>>, vector<1x16x128xf32>
    %114 = vector.shape_cast %113 : vector<1x16x128xf32> to vector<16x128xf32>
    %115 = vector.shape_cast %111 : vector<16x128xf32> to vector<1x16x128xf32>
    tpu.vector_store %arg6[%112, %c0_32, %c0_33], %115 {strides = array<i32>} : memref<4x16x128xf32, #tpu.memory_space<vmem>>, vector<1x16x128xf32>,
    %c3_i32 = arith.constant 3 : i32
    %116 = arith.index_cast %c3_i32 : i32 to index
    %c0_34 = arith.constant 0 : index
    %c0_35 = arith.constant 0 : index
    %117 = vector.load %arg2[%116, %c0_34, %c0_35] : memref<4x16x512xbf16, #tpu.memory_space<vmem>>, vector<1x16x512xbf16>
    %118 = vector.shape_cast %117 : vector<1x16x512xbf16> to vector<16x512xbf16>
    %119 = arith.extf %118 : vector<16x512xbf16> to vector<16x512xf32>
    %120 = arith.truncf %111 : vector<16x128xf32> to vector<16x128xbf16>
    %c0_36 = arith.constant 0 : index
    %c0_37 = arith.constant 0 : index
    %121 = vector.load %arg3[%c0_36, %c0_37] : memref<128x512xbf16, #tpu.memory_space<vmem>>, vector<128x512xbf16>
    %cst_38 = arith.constant dense<0.000000e+00> : vector<16x512xf32>
    %122 = tpu.matmul %120, %121, %cst_38 {dimension_numbers = #tpu.dot_dimension_numbers<[1], [0], [0], [1], [0, 0, 1, 1], [], []>} : vector<16x128xbf16>, vector<128x512xbf16>, vector<16x512xf32> -> vector<16x512xf32>
    %123 = arith.addf %119, %122 : vector<16x512xf32>
    %124 = vector.extract_strided_slice %123 {offsets = [0, 0], sizes = [16, 128], strides = [1, 1]} : vector<16x512xf32> to vector<16x128xf32>
    %125 = arith.negf %124 : vector<16x128xf32>
    %126 = math.exp %125 : vector<16x128xf32>
    %cst_39 = arith.constant 1.000000e+00 : f32
    %127 = vector.broadcast %cst_39 : f32 to vector<16x128xf32>
    %128 = arith.addf %127, %126 : vector<16x128xf32>
    %129 = arith.divf %127, %128 : vector<16x128xf32>
    %130 = vector.extract_strided_slice %123 {offsets = [0, 128], sizes = [16, 128], strides = [1, 1]} : vector<16x512xf32> to vector<16x128xf32>
    %131 = arith.negf %130 : vector<16x128xf32>
    %132 = math.exp %131 : vector<16x128xf32>
    %cst_40 = arith.constant 1.000000e+00 : f32
    %133 = vector.broadcast %cst_40 : f32 to vector<16x128xf32>
    %134 = arith.addf %133, %132 : vector<16x128xf32>
    %135 = arith.divf %133, %134 : vector<16x128xf32>
    %136 = vector.extract_strided_slice %123 {offsets = [0, 256], sizes = [16, 128], strides = [1, 1]} : vector<16x512xf32> to vector<16x128xf32>
    %137 = math.tanh %136 : vector<16x128xf32>
    %138 = vector.extract_strided_slice %123 {offsets = [0, 384], sizes = [16, 128], strides = [1, 1]} : vector<16x512xf32> to vector<16x128xf32>
    %139 = arith.negf %138 : vector<16x128xf32>
    %140 = math.exp %139 : vector<16x128xf32>
    %cst_41 = arith.constant 1.000000e+00 : f32
    %141 = vector.broadcast %cst_41 : f32 to vector<16x128xf32>
    %142 = arith.addf %141, %140 : vector<16x128xf32>
    %143 = arith.divf %141, %142 : vector<16x128xf32>
    %144 = arith.mulf %135, %109 : vector<16x128xf32>
    %145 = arith.mulf %129, %137 : vector<16x128xf32>
    %146 = arith.addf %144, %145 : vector<16x128xf32>
    %147 = math.tanh %146 : vector<16x128xf32>
    %148 = arith.mulf %143, %147 : vector<16x128xf32>
    %149 = arith.index_cast %c3_i32 : i32 to index
    %c0_42 = arith.constant 0 : index
    %c0_43 = arith.constant 0 : index
    %150 = vector.load %arg6[%149, %c0_42, %c0_43] : memref<4x16x128xf32, #tpu.memory_space<vmem>>, vector<1x16x128xf32>
    %151 = vector.shape_cast %150 : vector<1x16x128xf32> to vector<16x128xf32>
    %152 = vector.shape_cast %148 : vector<16x128xf32> to vector<1x16x128xf32>
    tpu.vector_store %arg6[%149, %c0_42, %c0_43], %152 {strides = array<i32>} : memref<4x16x128xf32, #tpu.memory_space<vmem>>, vector<1x16x128xf32>,
    %c4_i32 = arith.constant 4 : i32
    %c0_44 = arith.constant 0 : index
    %c0_45 = arith.constant 0 : index
    %153 = vector.load %arg8[%c0_44, %c0_45] : memref<16x128xf32, #tpu.memory_space<vmem>>, vector<16x128xf32>
    tpu.vector_store %arg8[%c0_44, %c0_45], %148 {strides = array<i32>} : memref<16x128xf32, #tpu.memory_space<vmem>>, vector<16x128xf32>,
    %c0_46 = arith.constant 0 : index
    %c0_47 = arith.constant 0 : index
    %154 = vector.load %arg9[%c0_46, %c0_47] : memref<16x128xf32, #tpu.memory_space<vmem>>, vector<16x128xf32>
    tpu.vector_store %arg9[%c0_46, %c0_47], %146 {strides = array<i32>} : memref<16x128xf32, #tpu.memory_space<vmem>>, vector<16x128xf32>,
    %c0_48 = arith.constant 0 : index
    %c0_49 = arith.constant 0 : index
    %c0_50 = arith.constant 0 : index
    %155 = vector.load %arg7[%c0_48, %c0_49, %c0_50] : memref<1x16x128xf32, #tpu.memory_space<vmem>>, vector<1x16x128xf32>
    %156 = vector.shape_cast %155 : vector<1x16x128xf32> to vector<16x128xf32>
    %157 = vector.shape_cast %146 : vector<16x128xf32> to vector<1x16x128xf32>
    tpu.vector_store %arg7[%c0_48, %c0_49, %c0_50], %157 {strides = array<i32>} : memref<1x16x128xf32, #tpu.memory_space<vmem>>, vector<1x16x128xf32>,
    return
  }
  func.func @transform_0(%arg0: i32, %arg1: i32) -> (i32, i32, i32) {
    %c0_i32 = arith.constant 0 : i32
    %c0_i32_0 = arith.constant 0 : i32
    return %arg1, %arg0, %c0_i32 : i32, i32, i32
  }
  func.func @transform_1(%arg0: i32, %arg1: i32) -> (i32, i32) {
    %c0_i32 = arith.constant 0 : i32
    %c0_i32_0 = arith.constant 0 : i32
    %c0_i32_1 = arith.constant 0 : i32
    return %c0_i32, %c0_i32_0 : i32, i32
  }
  func.func @transform_2(%arg0: i32, %arg1: i32) -> (i32, i32, i32) {
    %c0_i32 = arith.constant 0 : i32
    %c0_i32_0 = arith.constant 0 : i32
    %c0_i32_1 = arith.constant 0 : i32
    return %c0_i32, %arg0, %c0_i32_0 : i32, i32, i32
  }
  func.func @transform_3(%arg0: i32, %arg1: i32) -> (i32, i32, i32) {
    %c0_i32 = arith.constant 0 : i32
    %c0_i32_0 = arith.constant 0 : i32
    %c0_i32_1 = arith.constant 0 : i32
    return %c0_i32, %arg0, %c0_i32_0 : i32, i32, i32
  }
  func.func @transform_4(%arg0: i32, %arg1: i32) -> (i32, i32, i32) {
    %c0_i32 = arith.constant 0 : i32
    %c0_i32_0 = arith.constant 0 : i32
    return %arg1, %arg0, %c0_i32 : i32, i32, i32
  }
  func.func @transform_5(%arg0: i32, %arg1: i32) -> (i32, i32, i32) {
    %c0_i32 = arith.constant 0 : i32
    %c0_i32_0 = arith.constant 0 : i32
    %c0_i32_1 = arith.constant 0 : i32
    return %c0_i32, %arg0, %c0_i32_0 : i32, i32, i32
  }
}

</mosaic_0001>

<bundles_post_ra>
// kernel: tpu_custom_call.1
= control target key start
LH: loop header
LB: loop body
LE: loop exit
PB: predicated region body
PF: predicated region fallthrough
CT: control target
= control target key end

     0   :  { %s3263_s0 = inlined_call_operand.hbm [shape: bf16[8,16,512], index: 0, kind: input, shape index: {}]   ;;  %s3264_s1 = inlined_call_operand.hbm [shape: bf16[128,512], index: 1, kind: input, shape index: {}]   ;;  %s3265_s2 = inlined_call_operand.hbm [shape: f32[1,16,128], index: 2, kind: input, shape index: {}]   ;;  %s3266_s3 = inlined_call_operand.hbm [shape: f32[1,16,128], index: 3, kind: input, shape index: {}]   ;;  %s3267_s4 = inlined_call_operand.hbm [shape: f32[8,16,128], index: 4, kind: output, shape index: {0}]   ;;  %s3268_s5 = inlined_call_operand.hbm [shape: f32[1,16,128], index: 5, kind: output, shape index: {1}]  }
   0x1   :  { %3277 = sst [smem:[#allocation21_spill]] %s3264_s1 }
   0x2   :  { %11 = vsyncpa [#allocation5], 0 }
   0x3   :  { %13 = vsyncpa [#allocation5 + $0x1], 0 }
   0x4   :  { %14 = vsyncpa [#allocation8], 0 }
   0x5   :  { %15 = vsyncpa [#allocation11], 0 }
   0x6   :  { %16 = vsyncpa [#allocation6], 0 }
   0x7   :  { %18 = vsyncpa [#allocation6 + $0x1], 0 }
   0x8   :  { %19 = vsyncpa [#allocation14], 0  ;;  %s2705_s18 = smov 0   ;;  %s2707_s19 = smov 0  }
   0x9   :  { %s2709_s20 = smov 0   ;;  %s2711_s21 = smov 0  }
   0xa   :  { %s2713_s22 = smov 0   ;;  %s2715_s23 = smov 0  }
   0xb LB: > { %s1925_s24 = sadd.s32 4294967295, %s2660_s23   ;;  %s1926_s25 = sadd.s32 4294967294, %s2660_s23   ;;  %s2660_s23 = sphi %s2715_s23, %s25_s23   ;;  %s2656_s22 = sphi %s2713_s22, %s3304_s22   ;;  %s2652_s21 = sphi %s2711_s21, %s3303_s21   ;;  %s2648_s20 = sphi %s2709_s20, %s3302_s20   ;;  %s2644_s19 = sphi %s2707_s19, %s3301_s19   ;;  %s2640_s18 = sphi %s2705_s18, %s3300_s18  }
   0xc   : > { %p59_p0 = scmp.ne.s32.totalorder %s2644_s19, %s2640_s18  ;;  %p2739_p1 = scmp.eq.s32.totalorder %s1925_s24, 0 }
   0xd   : > { %p2743_p2 = scmp.eq.s32.totalorder %s1925_s24, 1  ;;  %p164_p3 = scmp.eq.s32.totalorder %s1926_s25, 1 }
   0xe   : > { %s3278_s26 = scalar_select %p2739_p1, 1, 0 }
   0xf   : > { %s3279_s27 = scalar_select %p2743_p2, 1, 0 }
  0x10   : > { %p2749_p4 = por %p2739_p1, %p59_p0  ;;  %p1927_p5 = scmp.ge.s32.totalorder %s2660_s23, 1 }
  0x11   : > { %p2754_p6 = por %p164_p3, %p59_p0  ;;  %p197_p7 = scmp.lt.s32.totalorder %s2660_s23, 3 }
  0x12   : > { %s3280_s28 = scalar_select %p2749_p4, 1, 0 }
  0x13   : > { %s3281_s29 = scalar_select %p2754_p6, 1, 0 }
  0x14   : > { %p2759_p8 = pnand %p1927_p5, %p197_p7  ;;  %s2662_s6 = smov [#allocation7]  }
  0x15   : > { %3282 = sst [smem:[#allocation20_spill]] %s3281_s29  ;;  %s209_s7 = sshll.u32 %s2662_s6, 4  ;;  %s2763_s7 = int_to_ptr.vmem [resolvable:$true] %s209_s7 }
  0x16   : > { %s3283_s30 = scalar_select %p2759_p8, 1, 0 }
  0x17   : > { %p2145_p9 = pneg %p2759_p8  ;;  %s2663_s9 = smov [#allocation9]  }
  0x18   : > { %s225_s10 = sshll.u32 %s2663_s9, 4  ;;  %s3285_s1 = sld [smem:[#allocation21_spill]]  ;;  %s2774_s10 = int_to_ptr.vmem [resolvable:$true] %s225_s10 }
  0x19   : > { %p2770_p11 = pnand %p2145_p9, %p2739_p1 }
  0x1b   : > { %p2784_p13 = pneg %p2770_p11 }
  0x1e   : > { %s2426_s13 = scalar_lea.hbm %s3285_s1, 4096 }
  0x1f   : > { %p2427_p12 = scmp.ne.s32.totalorder %s3285_s1, %s2426_s13  ;;  %p2433_p5 = scmp.lt.u32.totalorder %s2426_s13, %s3285_s1 }
  0x21   : > { %p2429_p0 = pnand %p2784_p13, %p2427_p12 }
  0x23   : > { %p2430_p3 = pneg %p2429_p0 }
  0x25   : > { %p2435_p7 = pnand %p2433_p5, %p2430_p3 }
  0x27   : > { %2438 = shalt.err (!%p2435_p7)
}
  0x28   : > { %s2439_s25 = scalar_lea.vmem %s2763_s7, 4096  ;;  %p2447_p1 = scmp.lt.s32.totalorder %s2763_s7, %s2763_s7 }
  0x29   : > { %p2440_p9 = scmp.ne.s32.totalorder %s2763_s7, %s2439_s25  ;;  %p2448_p4 = scmp.lt.s32.totalorder %s2439_s25, %s2439_s25 }
  0x2b   : > { %p2442_p10 = pnand %p2440_p9, %p2784_p13  ;;  %p2449_p12 = por %p2448_p4, %p2447_p1 }
  0x2d   : > { %p2443_p6 = pneg %p2442_p10 }
  0x2f   : > { %p2450_p0 = pnand %p2449_p12, %p2443_p6 }
  0x31   : > { %2453 = shalt.err (!%p2450_p0)
}
  0x32   : > { %s3273_s6 = smov 256   ;;  %s3274_s9 = smov 16  }
  0x33   : > { %2148 = dma.hbm_to_vmem [thread:$0]  (!%p2770_p11), %s3285_s1, 4096, %s2763_s7, [#allocation8], %s3273_s6, %s3273_s6, %s3274_s9  }
  0x34   : > { %s2454_s15 = scalar_lea.hbm %s3265_s2, 256 }
  0x35   : > { %p2455_p1 = scmp.ne.s32.totalorder %s3265_s2, %s2454_s15  ;;  %p2461_p10 = scmp.lt.u32.totalorder %s2454_s15, %s3265_s2 }
  0x37   : > { %p2457_p4 = pnand %p2455_p1, %p2784_p13 }
  0x39   : > { %p2458_p6 = pneg %p2457_p4 }
  0x3b   : > { %p2463_p3 = pnand %p2461_p10, %p2458_p6 }
  0x3d   : > { %2466 = shalt.err (!%p2463_p3)
}
  0x3e   : > { %s2467_s7 = scalar_lea.vmem %s2774_s10, 256  ;;  %p2475_p12 = scmp.lt.s32.totalorder %s2774_s10, %s2774_s10 }
  0x3f   : > { %p2468_p5 = scmp.ne.s32.totalorder %s2774_s10, %s2467_s7  ;;  %p2476_p0 = scmp.lt.s32.totalorder %s2467_s7, %s2467_s7 }
  0x41   : > { %p2470_p7 = pnand %p2468_p5, %p2784_p13  ;;  %p2477_p1 = por %p2476_p0, %p2475_p12 }
  0x43   : > { %p2471_p9 = pneg %p2470_p7 }
  0x45   : > { %p2478_p4 = pnand %p2477_p1, %p2471_p9 }
  0x47   : > { %2481 = shalt.err (!%p2478_p4)
}
  0x48   : > { %s2666_s11 = smov 128   ;;  %s2667_s29 = smov 8  }
  0x49   : > { %2151 = dma.hbm_to_vmem [thread:$0]  (!%p2770_p11), %s3265_s2, 256, %s2774_s10, [#allocation8], %s2666_s11, %s2666_s11, %s2667_s29  }
  0x4a   : > { %s2668_s14 = smov [#allocation10]   ;;  %s2482_s25 = scalar_lea.hbm %s3266_s3, 256 }
  0x4b   : > { %s241_s15 = sshll.u32 %s2668_s14, 4  ;;  %p2483_p6 = scmp.ne.s32.totalorder %s3266_s3, %s2482_s25  ;;  %s242_s15 = int_to_ptr.vmem [resolvable:$true] %s241_s15 }
  0x4c   : > { %p2489_p5 = scmp.lt.u32.totalorder %s2482_s25, %s3266_s3 }
  0x4d   : > { %p2485_p10 = pnand %p2483_p6, %p2784_p13 }
  0x4f   : > { %p2486_p3 = pneg %p2485_p10 }
  0x51   : > { %p2491_p7 = pnand %p2489_p5, %p2486_p3 }
  0x53   : > { %2494 = shalt.err (!%p2491_p7)
}
  0x54   : > { %s2495_s10 = scalar_lea.vmem %s242_s15, 256  ;;  %p2503_p1 = scmp.lt.s32.totalorder %s242_s15, %s242_s15 }
  0x55   : > { %p2496_p9 = scmp.ne.s32.totalorder %s242_s15, %s2495_s10  ;;  %p2504_p4 = scmp.lt.s32.totalorder %s2495_s10, %s2495_s10 }
  0x57   : > { %p2498_p12 = pnand %p2496_p9, %p2784_p13  ;;  %p2505_p8 = por %p2504_p4, %p2503_p1 }
  0x59   : > { %p2499_p0 = pneg %p2498_p12 }
  0x5b   : > { %p2506_p2 = pnand %p2505_p8, %p2499_p0 }
  0x5d   : > { %2509 = shalt.err (!%p2506_p2)
}
  0x5e   : > { %2154 = dma.hbm_to_vmem [thread:$0]  (!%p2770_p11), %s3266_s3, 256, %s242_s15, [#allocation11], %s2666_s11, %s2666_s11, %s2667_s29  }
  0x5f   : > { %s34_s1 = sadd.s32 1, %s2656_s22  ;;  %s46_s16 = sadd.s32 1, %s2648_s20 }
  0x60   : > { %p35_p8 = scmp.ge.s32.totalorder %s34_s1, 2  ;;  %p53_p2 = scmp.ne.s32.totalorder %s2648_s20, %s2644_s19 }
  0x61   : > { %p54_p13 = scmp.eq.s32.totalorder %s2660_s23, 0  ;;  %p3288_p10 = scmp.ne.s32.totalorder %s3279_s27, 0 }
  0x62   : > { %s3306_s1 = smov (%p35_p8, %s34_s1), 0  ;;  %p2166_p11 = scmp.lt.s32.totalorder %s2660_s23, 2 }
  0x63   : > { %p2856_p6 = por %p54_p13, %p53_p2  ;;  %p2862_p3 = por %p3288_p10, %p53_p2 }
  0x64   : > { %s41_s13 = ssub.s32 %s2656_s22, %s3306_s1  ;;  %s255_s11 = sand.u32 1, %s2648_s20  }
  0x65   : > { %p44_p5 = scmp.eq.s32.totalorder %s41_s13, 0  ;;  %s1932_s29 = sshll.u32 %s255_s11, 7 }
  0x66   : > { %s2122_s15 = sshll.u32 %s2656_s22, 11  ;;  %s259_s7 = scalar_lea.vmem [#allocation4], %s1932_s29 }
  0x67   : > { %s2871_s14 = scalar_select %p44_p5, %s2648_s20, %s46_s16  }
  0x68   : > { %s2877_s25 = scalar_lea.hbm %s3263_s0, %s2122_s15  ;;  %s270_s10 = sshll.u32 %s259_s7, 4  ;;  %s2879_s10 = int_to_ptr.vmem [resolvable:$true] %s270_s10 }
  0x69   : > { %p2883_p7 = pnand %p2166_p11, %p2856_p6  ;;  %s2887_s12 = scalar_lea.sflag [#allocation5], %s255_s11 }
  0x6a   : > { %s2510_s16 = scalar_lea.hbm %s2877_s25, 2048  ;;  %s2515_s8 = scalar_lea.hbm %s3263_s0, 4096 }
  0x6b   : > { %p2511_p9 = scmp.ne.s32.totalorder %s2877_s25, %s2510_s16  ;;  %p2512_p12 = pneg %p2883_p7 }
  0x6c   : > { %p2516_p4 = scmp.lt.u32.totalorder %s2877_s25, %s3263_s0  ;;  %p2517_p8 = scmp.lt.u32.totalorder %s2515_s8, %s2510_s16 }
  0x6d   : > { %p2513_p0 = pnand %p2512_p12, %p2511_p9  ;;  %p2519_p13 = scmp.lt.u32.totalorder %s2510_s16, %s2877_s25 }
  0x6e   : > { %p2518_p2 = por %p2517_p8, %p2516_p4 }
  0x6f   : > { %p2514_p1 = pneg %p2513_p0 }
  0x70   : > { %p2520_p6 = por %p2519_p13, %p2518_p2 }
  0x72   : > { %p2521_p10 = pnand %p2520_p6, %p2514_p1 }
  0x74   : > { %2524 = shalt.err (!%p2521_p10)
}
  0x75   : > { %s2525_s11 = scalar_lea.vmem %s2879_s10, 2048  ;;  %s2669_s24 = smov [#allocation4]  }
  0x76   : > { %p2526_p11 = scmp.ne.s32.totalorder %s2879_s10, %s2525_s11  ;;  %s2530_s7 = sshll.u32 %s2669_s24, 4  ;;  %s2531_s7 = int_to_ptr.vmem [resolvable:$false] %s2530_s7 }
  0x77   : > { %s2532_s13 = scalar_lea.vmem %s2531_s7, 4096  ;;  %p2533_p0 = scmp.lt.s32.totalorder %s2879_s10, %s2531_s7 }
  0x78   : > { %p2528_p5 = pnand %p2526_p11, %p2512_p12  ;;  %p2534_p4 = scmp.lt.s32.totalorder %s2532_s13, %s2525_s11 }
  0x7a   : > { %p2529_p9 = pneg %p2528_p5  ;;  %p2535_p8 = por %p2534_p4, %p2533_p0 }
  0x7c   : > { %p2536_p2 = pnand %p2535_p8, %p2529_p9 }
  0x7e   : > { %2539 = shalt.err (!%p2536_p2)
}
  0x7f   : > { %s3291_s16 = smov 16   ;;  %s3292_s29 = smov 256  }
  0x80   : > { %2158 = dma.hbm_to_vmem [thread:$0]  (!%p2883_p7), %s2877_s25, 2048, %s2879_s10, %s2887_s12, %s3292_s29, %s3292_s29, %s3291_s16  }
  0x81   : > { %p3293_p12 = scmp.ne.s32.totalorder %s3283_s30, 0 }
  0x82   : > { %s2921_s8 = sand.u32 (!%p3293_p12), 1, %s2644_s19   ;;  %p3294_p1 = scmp.ne.s32.totalorder (!%p3293_p12), %s3280_s28, 0 }
  0x83   : > { %282 = sbr.rel (%p3293_p12) target bundleno = 1263 (0x4ef), region = 36  ;;  %s1937_s15 = sshll.u32 (!%p3293_p12), %s2921_s8, 7 }
  0x84   : > { %s285_s17 = scalar_lea.sflag (!%p3293_p12), [#allocation5], %s2921_s8  ;;  %s2925_s11 = scalar_lea.vmem (!%p3293_p12), [#allocation4], %s1937_s15 }
  0x8a   : > { %2619 = dma.done.wait (%p3294_p1), %s285_s17, 2048  }
  0x8b   : > { %2621 = vsyncadd (%p3294_p1), %s285_s17, 4294965248  ;;  %p3295_p7 = scmp.ne.s32.totalorder %s3278_s26, 0 }
  0x8d   : > { %2623 = dma.done.wait (%p3295_p7), [#allocation8], 4352  }
  0x8e   : > { %2625 = vsyncadd (%p3295_p7), [#allocation8], 4294962944 }
  0x8f   : > { %2627 = dma.done.wait (%p3295_p7), [#allocation11], 256  }
  0x90   : > { %2629 = vsyncadd (%p3295_p7), [#allocation11], 4294967040  ;;  %s1941_s30 = sshll.u32 %s2921_s8, 6  ;;  %p1942_p13 = scmp.ne.s32.totalorder %s2652_s21, 0 }
  0x91   : > { %s2940_s25 = scalar_lea.vmem [#allocation12], %s1941_s30  ;;  %v339_v0 = vld [vmem:[#allocation9] sm:$0xff] (!%p1942_p13)  ;;  %v340_v1 = vld [vmem:[#allocation9 + $0x8] sm:$0xff] (!%p1942_p13)  ;;  %v343_v2 = vld [vmem:[#allocation10] sm:$0xff] (!%p1942_p13) }
  0x92   : > { %338 = sbr.rel (%p1942_p13) target bundleno = 153 (0x99), region = 56  ;;  %341 = vst [vmem:[#allocation2] sm:$0xff] (!%p1942_p13), %v339_v0  ;;  %342 = vst [vmem:[#allocation2 + $0x8] sm:$0xff] (!%p1942_p13), %v340_v1  ;;  %v344_v3 = vld [vmem:[#allocation10 + $0x8] sm:$0xff] (!%p1942_p13) }
  0x93   : > { %345 = vst [vmem:[#allocation3] sm:$0xff] (!%p1942_p13), %v343_v2  ;;  %346 = vst [vmem:[#allocation3 + $0x8] sm:$0xff] (!%p1942_p13), %v344_v3 }
  0x99 PF: > { %v2943_v4 = vld [vmem:[#allocation7 + $0x4] ss:$16 sps:$4 sm:$0xff]   ;;  %v2945_v5 = vld [vmem:[#allocation7] ss:$16 sps:$4 sm:$0xff]   ;;  %v2670_v6 = vmov 0   ;;  %v348_v35 = vld [vmem:[#allocation2 + $0x8] sm:$0xff] }
  0x9a   : > { %588 = vmatprep.mubr.bf16.mxu0 %v2670_v6  ;;  %631 = vmatprep.mubr.bf16.mxu1 %v2670_v6  ;;  %v2950_v7 = vld [vmem:[#allocation7 + $0x24] ss:$16 sps:$4 sm:$0xff]   ;;  %v2953_v8 = vld [vmem:[#allocation7 + $0x20] ss:$16 sps:$4 sm:$0xff]   ;;  %v2958_v10 = vld [vmem:[#allocation7 + $0xc] ss:$16 sps:$4 sm:$0xff]  }
  0x9b   : > { %556 = vmatprep.subr.bf16.mxu0 %v2943_v4  ;;  %v2956_v9 = vld [vmem:[#allocation7 + $0x44] ss:$16 sps:$4 sm:$0xff]   ;;  %v2960_v11 = vld [vmem:[#allocation7 + $0x8] ss:$16 sps:$4 sm:$0xff]   ;;  %v2963_v12 = vld [vmem:[#allocation7 + $0x40] ss:$16 sps:$4 sm:$0xff]   ;;  %599 = vmatprep.subr.bf16.mxu1 %v2958_v10 }
  0x9c   : > { %557 = vmatpush1.bf16.msra.mxu0 %v2945_v5  ;;  %v2967_v13 = vld [vmem:[#allocation7 + $0x64] ss:$16 sps:$4 sm:$0xff]   ;;  %600 = vmatpush1.bf16.msra.mxu1 %v2960_v11  ;;  %v2970_v14 = vld [vmem:[#allocation7 + $0x2c] ss:$16 sps:$4 sm:$0xff]   ;;  %v2972_v15 = vld [vmem:[#allocation7 + $0x28] ss:$16 sps:$4 sm:$0xff]  }
  0x9d   : > { %558 = vmatprep.subr.bf16.mxu0 %v2950_v7  ;;  %601 = vmatprep.subr.bf16.mxu1 %v2970_v14  ;;  %v2976_v16 = vld [vmem:[#allocation7 + $0x60] ss:$16 sps:$4 sm:$0xff]   ;;  %v2978_v17 = vld [vmem:[#allocation7 + $0x84] ss:$16 sps:$4 sm:$0xff]   ;;  %v2980_v18 = vld [vmem:[#allocation7 + $0x4c] ss:$16 sps:$4 sm:$0xff]  }
  0x9e   : > { %v2984_v19 = vld [vmem:[#allocation7 + $0x48] ss:$16 sps:$4 sm:$0xff]   ;;  %v2987_v20 = vld [vmem:[#allocation7 + $0x6c] ss:$16 sps:$4 sm:$0xff]   ;;  %v2990_v21 = vld [vmem:[#allocation7 + $0x80] ss:$16 sps:$4 sm:$0xff]  }
  0x9f   : > { %v2993_v22 = vld [vmem:[#allocation7 + $0xa4] ss:$16 sps:$4 sm:$0xff]   ;;  %v2996_v23 = vld [vmem:[#allocation7 + $0x68] ss:$16 sps:$4 sm:$0xff]   ;;  %v2999_v24 = vld [vmem:[#allocation7 + $0x8c] ss:$16 sps:$4 sm:$0xff]  }
  0xa0   : > { %559 = vmatpush1.bf16.msra.mxu0 %v2953_v8  ;;  %602 = vmatpush1.bf16.msra.mxu1 %v2972_v15  ;;  %v3002_v25 = vld [vmem:[#allocation7 + $0xa0] ss:$16 sps:$4 sm:$0xff]   ;;  %v3005_v26 = vld [vmem:[#allocation7 + $0xc4] ss:$16 sps:$4 sm:$0xff]   ;;  %v3008_v27 = vld [vmem:[#allocation7 + $0x88] ss:$16 sps:$4 sm:$0xff]  }
  0xa1   : > { %560 = vmatprep.subr.bf16.mxu0 %v2956_v9  ;;  %603 = vmatprep.subr.bf16.mxu1 %v2980_v18  ;;  %v3010_v28 = vld [vmem:[#allocation7 + $0xc0] ss:$16 sps:$4 sm:$0xff]   ;;  %v3013_v29 = vld [vmem:[#allocation7 + $0xac] ss:$16 sps:$4 sm:$0xff]   ;;  %v3015_v30 = vld [vmem:[#allocation7 + $0xe4] ss:$16 sps:$4 sm:$0xff]  }
  0xa2   : > { %v3017_v31 = vld [vmem:[#allocation7 + $0xa8] ss:$16 sps:$4 sm:$0xff]   ;;  %v3020_v32 = vld [vmem:[#allocation7 + $0xcc] ss:$16 sps:$4 sm:$0xff]   ;;  %v3026_v33 = vld [vmem:[#allocation7 + $0xe0] ss:$16 sps:$4 sm:$0xff]  }
  0xa3   : > { %v347_v34 = vld [vmem:[#allocation2] sm:$0xff]  ;;  %v3030_v36 = vld [vmem:[#allocation7 + $0xc8] ss:$16 sps:$4 sm:$0xff]   ;;  %v3033_v37 = vld [vmem:[#allocation7 + $0xec] ss:$16 sps:$4 sm:$0xff]   ;;  %s2671_s26 = smov [#allocation13]  }
  0xa4   : > { %561 = vmatpush1.bf16.msra.mxu0 %v2963_v12  ;;  %604 = vmatpush1.bf16.msra.mxu1 %v2984_v19  ;;  %v363_v38 = vpack.c.bf16 %v348_v35, %v347_v34  ;;  %v3037_v39 = vld [vmem:[#allocation7 + $0xe8] ss:$16 sps:$4 sm:$0xff]   ;;  %v351_v40 = vld [vmem:[%s2925_s11] sm:$0xff]  ;;  %v353_v41 = vld [vmem:[%s2925_s11 + $0x10] sm:$0xff]  ;;  %s1792_s28 = sshll.u32 %s2671_s26, 4  ;;  %p3296_p10 = scmp.ne.s32.totalorder %s3279_s27, 0  ;;  %s1793_s28 = int_to_ptr.vmem [resolvable:$true] %s1792_s28 }
  0xa5   : > { %562 = vmatprep.subr.bf16.mxu0 %v2967_v13  ;;  %605 = vmatprep.subr.bf16.mxu1 %v2987_v20  ;;  %v355_v42 = vunpack.c.l.bf16 %v351_v40  ;;  %v356_v43 = vunpack.c.h.bf16 %v351_v40  ;;  %v359_v44 = vunpack.c.l.bf16 %v353_v41  ;;  %v360_v46 = vunpack.c.h.bf16 %v353_v41  ;;  %v352_v47 = vld [vmem:[%s2925_s11 + $0x8] sm:$0xff]  ;;  %v354_v52 = vld [vmem:[%s2925_s11 + $0x18] sm:$0xff]  ;;  %s2540_s10 = scalar_lea.vmem %s1793_s28, 256  ;;  %p2547_p9 = scmp.lt.s32.totalorder %s1793_s28, %s1793_s28 }
  0xa6   : > { %v358_v56 = vunpack.c.h.bf16 %v352_v47  ;;  %v362_v61 = vunpack.c.h.bf16 %v354_v52  ;;  %v357_v63 = vunpack.c.l.bf16 %v352_v47  ;;  %v361_v3 = vunpack.c.l.bf16 %v354_v52  ;;  %p2541_p6 = scmp.ne.s32.totalorder %s1793_s28, %s2540_s10  ;;  %p2548_p0 = scmp.lt.s32.totalorder %s2540_s10, %s2540_s10 }
  0xa8   : > { %563 = vmatpush1.bf16.msra.mxu0 %v2976_v16  ;;  %606 = vmatpush1.bf16.msra.mxu1 %v2996_v23  ;;  %p2542_p11 = pnand %p2541_p6, %p3296_p10  ;;  %p2549_p4 = por %p2548_p0, %p2547_p9 }
  0xa9   : > { %564 = vmatprep.subr.bf16.mxu0 %v2978_v17  ;;  %607 = vmatprep.subr.bf16.mxu1 %v2999_v24 }
  0xaa   : > { %p2543_p5 = pneg %p2542_p11 }
  0xac   : > { %565 = vmatpush1.bf16.msra.mxu0 %v2990_v21  ;;  %608 = vmatpush1.bf16.msra.mxu1 %v3008_v27  ;;  %p2550_p8 = pnand %p2549_p4, %p2543_p5 }
  0xad   : > { %566 = vmatprep.subr.bf16.mxu0 %v2993_v22  ;;  %609 = vmatprep.subr.bf16.mxu1 %v3013_v29 }
  0xb0   : > { %567 = vmatpush1.bf16.msra.mxu0 %v3002_v25  ;;  %610 = vmatpush1.bf16.msra.mxu1 %v3017_v31 }
  0xb1   : > { %568 = vmatprep.subr.bf16.mxu0 %v3005_v26  ;;  %611 = vmatprep.subr.bf16.mxu1 %v3020_v32 }
  0xb4   : > { %569 = vmatpush1.bf16.msra.mxu0 %v3010_v28  ;;  %612 = vmatpush1.bf16.msra.mxu1 %v3030_v36 }
  0xb5   : > { %570 = vmatprep.subr.bf16.mxu0 %v3015_v30  ;;  %613 = vmatprep.subr.bf16.mxu1 %v3033_v37 }
  0xb8   : > { %571 = vmatpush1.bf16.msra.mxu0 %v3026_v33  ;;  %614 = vmatpush1.bf16.msra.mxu1 %v3037_v39 }
  0xb9   : > { %906 = vmatprep.subr.bf16.mxu0 %v2943_v4  ;;  %949 = vmatprep.subr.bf16.mxu1 %v2958_v10 }
  0xbb   : > { %589 = vmatmul.mubr.bf16.vlgmr.msra.gmra.mrb[0].mxu0 %v363_v38  ;;  %632 = vmatmul.mubr.bf16.vlgmr.msra.gmra.mrb[0].mxu1 %v363_v38 }
  0xbc   : > { %907 = vmatpush1.bf16.msra.mxu0 %v2945_v5  ;;  %938 = vmatprep.mubr.bf16.mxu0 %v2670_v6 }
  0xbd   : > { %908 = vmatprep.subr.bf16.mxu0 %v2950_v7  ;;  %950 = vmatpush1.bf16.msra.mxu1 %v2960_v11 }
  0xbe   : > { %951 = vmatprep.subr.bf16.mxu1 %v2970_v14  ;;  %981 = vmatprep.mubr.bf16.mxu1 %v2670_v6 }
  0xc0   : > { %909 = vmatpush1.bf16.msra.mxu0 %v2953_v8 }
  0xc1   : > { %910 = vmatprep.subr.bf16.mxu0 %v2956_v9  ;;  %952 = vmatpush1.bf16.msra.mxu1 %v2972_v15 }
  0xc2   : > { %953 = vmatprep.subr.bf16.mxu1 %v2980_v18 }
  0xc4   : > { %911 = vmatpush1.bf16.msra.mxu0 %v2963_v12 }
  0xc5   : > { %912 = vmatprep.subr.bf16.mxu0 %v2967_v13  ;;  %954 = vmatpush1.bf16.msra.mxu1 %v2984_v19 }
  0xc6   : > { %955 = vmatprep.subr.bf16.mxu1 %v2987_v20 }
  0xc8   : > { %913 = vmatpush1.bf16.msra.mxu0 %v2976_v16 }
  0xc9   : > { %914 = vmatprep.subr.bf16.mxu0 %v2978_v17  ;;  %956 = vmatpush1.bf16.msra.mxu1 %v2996_v23 }
  0xca   : > { %957 = vmatprep.subr.bf16.mxu1 %v2999_v24 }
  0xcc   : > { %915 = vmatpush1.bf16.msra.mxu0 %v2990_v21 }
  0xcd   : > { %916 = vmatprep.subr.bf16.mxu0 %v2993_v22  ;;  %958 = vmatpush1.bf16.msra.mxu1 %v3008_v27 }
  0xce   : > { %959 = vmatprep.subr.bf16.mxu1 %v3013_v29 }
  0xd0   : > { %917 = vmatpush1.bf16.msra.mxu0 %v3002_v25 }
  0xd1   : > { %918 = vmatprep.subr.bf16.mxu0 %v3005_v26  ;;  %960 = vmatpush1.bf16.msra.mxu1 %v3017_v31 }
  0xd2   : > { %961 = vmatprep.subr.bf16.mxu1 %v3020_v32 }
  0xd4   : > { %919 = vmatpush1.bf16.msra.mxu0 %v3010_v28 }
  0xd5   : > { %920 = vmatprep.subr.bf16.mxu0 %v3015_v30  ;;  %962 = vmatpush1.bf16.msra.mxu1 %v3030_v36 }
  0xd6   : > { %963 = vmatprep.subr.bf16.mxu1 %v3033_v37 }
  0xd8   : > { %921 = vmatpush1.bf16.msra.mxu0 %v3026_v33 }
  0xd9   : > { %1257 = vmatprep.subr.bf16.mxu0 %v2943_v4  ;;  %964 = vmatpush1.bf16.msra.mxu1 %v3037_v39 }
  0xda   : > { %1300 = vmatprep.subr.bf16.mxu1 %v2958_v10 }
 0x18e   : > { %v590_v45 = vpop.f32.mrb[0].mxu0  ;;  %v633_v60 = vpop.f32.mrb[0].mxu1 }
 0x18f   : > { %v642_v48 = vadd.f32 %v590_v45, %v355_v42  ;;  %v592_v49 = vpop.f32.mrb[1].mxu0  ;;  %v635_v0 = vpop.f32.mrb[1].mxu1  ;;  %v644_v38 = vadd.f32 %v633_v60, %v357_v63 }
 0x190   : > { %v643_v50 = vadd.f32 %v592_v49, %v356_v43  ;;  %v594_v51 = vpop.f32.mrb[2].mxu0  ;;  %v645_v1 = vadd.f32 %v635_v0, %v358_v56  ;;  %v637_v2 = vpop.f32.mrb[2].mxu1 }
 0x191   : > { %v1975_v53 = vmul.f32 -1.442695, %v642_v48  ;;  %v646_v54 = vadd.f32 %v594_v51, %v359_v44  ;;  %v596_v55 = vpop.f32.mrb[3].mxu0  ;;  %v639_v34 = vpop.f32.mrb[3].mxu1  ;;  %v648_v41 = vadd.f32 %v637_v2, %v361_v3 }
 0x192   : > { %v1977_v57 = vmul.f32 -1.442695, %v643_v50  ;;  %v647_v58 = vadd.f32 %v596_v55, %v360_v46  ;;  %v649_v35 = vadd.f32 %v639_v34, %v362_v61  ;;  %v1979_v40 = vmul.f32 -1.442695, %v645_v1  ;;  %v349_v55 = vld [vmem:[#allocation3] sm:$0xff] }
 0x193   : > { %2298 = vpow2.f32 %v1975_v53  ;;  %v1976_v59 = vmul.f32 -1.442695, %v646_v54 }
 0x194   : > { %2300 = vpow2.f32 %v1977_v57  ;;  %v1978_v62 = vmul.f32 -1.442695, %v647_v58  ;;  %v1980_v42 = vmul.f32 -1.442695, %v649_v35 }
 0x195   : > { %2302 = vpow2.f32 %v1976_v59  ;;  %v350_v59 = vld [vmem:[#allocation3 + $0x8] sm:$0xff] }
 0x196   : > { %2304 = vpow2.f32 %v1978_v62 }
 0x197   : > { %2306 = vtanh.f32 %v644_v38 }
 0x198   : > { %2308 = vpow2.f32 %v1979_v40 }
 0x199   : > { %2310 = vtanh.f32 %v648_v41 }
 0x19a   : > { %2312 = vpow2.f32 %v1980_v42 }
 0x19d   : > { %v2299_v43 = vpop.eup %2298 }
 0x19e   : > { %v2301_v44 = vpop.eup %2300  ;;  %v656_v45 = vadd.f32 1.0, %v2299_v43 }
 0x19f   : > { %v2303_v46 = vpop.eup %2302  ;;  %v668_v47 = vadd.f32 1.0, %v2301_v44 }
 0x1a0   : > { %v2305_v48 = vpop.eup %2304  ;;  %2314 = vrcp.f32 %v656_v45  ;;  %v657_v49 = vadd.f32 1.0, %v2303_v46 }
 0x1a1   : > { %2316 = vrcp.f32 %v668_v47  ;;  %v669_v50 = vadd.f32 1.0, %v2305_v48  ;;  %v2307_v51 = vpop.eup %2306 }
 0x1a2   : > { %2318 = vrcp.f32 %v657_v49  ;;  %v2309_v52 = vpop.eup %2308 }
 0x1a3   : > { %2320 = vrcp.f32 %v669_v50  ;;  %v2311_v53 = vpop.eup %2310  ;;  %v682_v57 = vadd.f32 1.0, %v2309_v52 }
 0x1a4   : > { %v2313_v54 = vpop.eup %2312 }
 0x1a5   : > { %v683_v1 = vadd.f32 1.0, %v2313_v54  ;;  %2322 = vrcp.f32 %v682_v57  ;;  %v1984_v54 = vld [vmem:[%s2925_s11 + $0x38] sm:$0xff] }
 0x1aa   : > { %v2315_v56 = vpop.eup %2314 }
 0x1ab   : > { %v2317_v58 = vpop.eup %2316  ;;  %v690_v60 = vmul.f32 %v2315_v56, %v2307_v51 }
 0x1ac   : > { %v2319_v61 = vpop.eup %2318  ;;  %v688_v62 = vmul.f32 %v2317_v58, %v349_v55  ;;  %v712_v58 = vunpack.c.h.bf16 %v1984_v54 }
 0x1ad   : > { %v2321_v63 = vpop.eup %2320  ;;  %v691_v0 = vmul.f32 %v2319_v61, %v2311_v53 }
 0x1ae   : > { %v689_v2 = vmul.f32 %v2321_v63, %v350_v59  ;;  %v3081_v3 = vadd.f32 %v690_v60, %v688_v62  ;;  %v711_v59 = vunpack.c.l.bf16 %v1984_v54 }
 0x1af   : > { %v2323_v35 = vpop.eup %2322 }
 0x1b0   : > { %2324 = vtanh.f32 %v3081_v3  ;;  %v3084_v34 = vadd.f32 %v691_v0, %v689_v2 }
 0x1b1   : > { %2326 = vrcp.f32 %v683_v1 }
 0x1b2   : > { %2328 = vtanh.f32 %v3084_v34 }
 0x1ba   : > { %v2325_v38 = vpop.eup %2324 }
 0x1bb   : > { %v2327_v40 = vpop.eup %2326  ;;  %v696_v41 = vmul.f32 %v2325_v38, %v2323_v35 }
 0x1bc   : > { %v2329_v42 = vpop.eup %2328 }
 0x1bd   : > { %v697_v43 = vmul.f32 %v2329_v42, %v2327_v40  ;;  %698 = vst [vmem:[%s2940_s25] sm:$0xff] %v696_v41 }
 0x1bf   : > { %699 = vst [vmem:[%s2940_s25 + $0x8] sm:$0xff] %v697_v43  ;;  %v713_v44 = vpack.c.bf16 %v697_v43, %v696_v41 }
 0x1c1   : > { %939 = vmatmul.mubr.bf16.vlgmr.msra.gmra.mrb[4].mxu0 %v713_v44  ;;  %982 = vmatmul.mubr.bf16.vlgmr.msra.gmra.mrb[4].mxu1 %v713_v44 }
 0x1c2   : > { %1258 = vmatpush1.bf16.msra.mxu0 %v2945_v5  ;;  %1301 = vmatpush1.bf16.msra.mxu1 %v2960_v11 }
 0x1c3   : > { %1259 = vmatprep.subr.bf16.mxu0 %v2950_v7  ;;  %1302 = vmatprep.subr.bf16.mxu1 %v2970_v14 }
 0x1c4   : > { %1289 = vmatprep.mubr.bf16.mxu0 %v2670_v6  ;;  %1332 = vmatprep.mubr.bf16.mxu1 %v2670_v6 }
 0x1c6   : > { %1260 = vmatpush1.bf16.msra.mxu0 %v2953_v8  ;;  %1303 = vmatpush1.bf16.msra.mxu1 %v2972_v15 }
 0x1c7   : > { %1261 = vmatprep.subr.bf16.mxu0 %v2956_v9  ;;  %1304 = vmatprep.subr.bf16.mxu1 %v2980_v18  ;;  %v1981_v9 = vld [vmem:[%s2925_s11 + $0x20] sm:$0xff] }
 0x1ca   : > { %1262 = vmatpush1.bf16.msra.mxu0 %v2963_v12  ;;  %1305 = vmatpush1.bf16.msra.mxu1 %v2984_v19  ;;  %v1983_v12 = vld [vmem:[%s2925_s11 + $0x30] sm:$0xff] }
 0x1cb   : > { %1263 = vmatprep.subr.bf16.mxu0 %v2967_v13  ;;  %1306 = vmatprep.subr.bf16.mxu1 %v2987_v20  ;;  %v705_v13 = vunpack.c.l.bf16 %v1981_v9 }
 0x1ce   : > { %1264 = vmatpush1.bf16.msra.mxu0 %v2976_v16  ;;  %1307 = vmatpush1.bf16.msra.mxu1 %v2996_v23  ;;  %v706_v16 = vunpack.c.h.bf16 %v1981_v9 }
 0x1cf   : > { %1265 = vmatprep.subr.bf16.mxu0 %v2978_v17  ;;  %1308 = vmatprep.subr.bf16.mxu1 %v2999_v24  ;;  %v709_v17 = vunpack.c.l.bf16 %v1983_v12 }
 0x1d2   : > { %1266 = vmatpush1.bf16.msra.mxu0 %v2990_v21  ;;  %1309 = vmatpush1.bf16.msra.mxu1 %v3008_v27 }
 0x1d3   : > { %1267 = vmatprep.subr.bf16.mxu0 %v2993_v22  ;;  %1310 = vmatprep.subr.bf16.mxu1 %v3013_v29 }
 0x1d6   : > { %1268 = vmatpush1.bf16.msra.mxu0 %v3002_v25  ;;  %1311 = vmatpush1.bf16.msra.mxu1 %v3017_v31  ;;  %v710_v25 = vunpack.c.h.bf16 %v1983_v12 }
 0x1d7   : > { %1269 = vmatprep.subr.bf16.mxu0 %v3005_v26  ;;  %1312 = vmatprep.subr.bf16.mxu1 %v3020_v32 }
 0x1da   : > { %1270 = vmatpush1.bf16.msra.mxu0 %v3010_v28  ;;  %1313 = vmatpush1.bf16.msra.mxu1 %v3030_v36  ;;  %v1982_v28 = vld [vmem:[%s2925_s11 + $0x28] sm:$0xff] }
 0x1db   : > { %1271 = vmatprep.subr.bf16.mxu0 %v3015_v30  ;;  %1314 = vmatprep.subr.bf16.mxu1 %v3033_v37  ;;  %v708_v51 = vunpack.c.h.bf16 %v1982_v28  ;;  %v707_v56 = vunpack.c.l.bf16 %v1982_v28 }
 0x1de   : > { %1272 = vmatpush1.bf16.msra.mxu0 %v3026_v33  ;;  %1315 = vmatpush1.bf16.msra.mxu1 %v3037_v39 }
 0x1df   : > { %1608 = vmatprep.subr.bf16.mxu0 %v2943_v4  ;;  %1651 = vmatprep.subr.bf16.mxu1 %v2958_v10 }
 0x294   : > { %v940_v21 = vpop.f32.mrb[4].mxu0  ;;  %v983_v22 = vpop.f32.mrb[4].mxu1 }
 0x295   : > { %v992_v26 = vadd.f32 %v940_v21, %v705_v13  ;;  %v942_v30 = vpop.f32.mrb[5].mxu0  ;;  %v985_v45 = vpop.f32.mrb[5].mxu1  ;;  %v994_v60 = vadd.f32 %v983_v22, %v707_v56 }
 0x296   : > { %v993_v33 = vadd.f32 %v942_v30, %v706_v16  ;;  %v944_v46 = vpop.f32.mrb[6].mxu0  ;;  %v987_v47 = vpop.f32.mrb[6].mxu1  ;;  %v995_v57 = vadd.f32 %v985_v45, %v708_v51 }
 0x297   : > { %v2017_v48 = vmul.f32 -1.442695, %v992_v26  ;;  %v996_v4 = vadd.f32 %v944_v46, %v709_v17  ;;  %v946_v49 = vpop.f32.mrb[7].mxu0  ;;  %v989_v10 = vpop.f32.mrb[7].mxu1  ;;  %v998_v63 = vadd.f32 %v987_v47, %v711_v59 }
 0x298   : > { %v2019_v50 = vmul.f32 -1.442695, %v993_v33  ;;  %v997_v52 = vadd.f32 %v946_v49, %v710_v25  ;;  %v2021_v61 = vmul.f32 -1.442695, %v995_v57  ;;  %v999_v62 = vadd.f32 %v989_v10, %v712_v58 }
 0x299   : > { %2330 = vpow2.f32 %v2017_v48  ;;  %v2018_v53 = vmul.f32 -1.442695, %v996_v4 }
 0x29a   : > { %2332 = vpow2.f32 %v2019_v50  ;;  %v2020_v55 = vmul.f32 -1.442695, %v997_v52  ;;  %v2022_v35 = vmul.f32 -1.442695, %v999_v62 }
 0x29b   : > { %2334 = vpow2.f32 %v2018_v53  ;;  %v2026_v53 = vld [vmem:[%s2925_s11 + $0x48] sm:$0xff] }
 0x29c   : > { %2336 = vpow2.f32 %v2020_v55 }
 0x29d   : > { %2338 = vtanh.f32 %v994_v60 }
 0x29e   : > { %2340 = vpow2.f32 %v2021_v61 }
 0x29f   : > { %2342 = vtanh.f32 %v998_v63 }
 0x2a3   : > { %v2331_v0 = vpop.eup %2330 }
 0x2a4   : > { %v2333_v1 = vpop.eup %2332  ;;  %v1006_v2 = vadd.f32 1.0, %v2331_v0  ;;  %v1059_v0 = vunpack.c.h.bf16 %v2026_v53 }
 0x2a5   : > { %v1018_v38 = vadd.f32 1.0, %v2333_v1  ;;  %v2335_v40 = vpop.eup %2334 }
 0x2a6   : > { %2344 = vrcp.f32 %v1006_v2  ;;  %v1007_v41 = vadd.f32 1.0, %v2335_v40  ;;  %v2337_v42 = vpop.eup %2336  ;;  %v1058_v40 = vunpack.c.l.bf16 %v2026_v53 }
 0x2a7   : > { %2346 = vrcp.f32 %v1018_v38  ;;  %v1019_v43 = vadd.f32 1.0, %v2337_v42  ;;  %v2339_v44 = vpop.eup %2338 }
 0x2a8   : > { %2348 = vpow2.f32 %v2022_v35  ;;  %v2341_v9 = vpop.eup %2340  ;;  %v2028_v35 = vld [vmem:[%s2925_s11 + $0x58] sm:$0xff] }
 0x2a9   : > { %2350 = vrcp.f32 %v1007_v41  ;;  %v2343_v12 = vpop.eup %2342  ;;  %v1032_v21 = vadd.f32 1.0, %v2341_v9  ;;  %v1063_v42 = vunpack.c.h.bf16 %v2028_v35 }
 0x2aa   : > { %2352 = vrcp.f32 %v1019_v43  ;;  %v1062_v43 = vunpack.c.l.bf16 %v2028_v35 }
 0x2ab   : > { %2354 = vrcp.f32 %v1032_v21 }
 0x2b0   : > { %v2345_v13 = vpop.eup %2344 }
 0x2b1   : > { %v2347_v16 = vpop.eup %2346  ;;  %v1040_v17 = vmul.f32 %v2345_v13, %v2339_v44 }
 0x2b2   : > { %v2349_v22 = vpop.eup %2348  ;;  %v1038_v25 = vmul.f32 %v2347_v16, %v3081_v3 }
 0x2b3   : > { %v2351_v26 = vpop.eup %2350  ;;  %v1033_v33 = vadd.f32 1.0, %v2349_v22 }
 0x2b4   : > { %v3128_v28 = vadd.f32 %v1040_v17, %v1038_v25  ;;  %v1041_v30 = vmul.f32 %v2351_v26, %v2343_v12  ;;  %v2353_v45 = vpop.eup %2352 }
 0x2b5   : > { %v1039_v46 = vmul.f32 %v2353_v45, %v3084_v34  ;;  %v2355_v48 = vpop.eup %2354 }
 0x2b6   : > { %2356 = vtanh.f32 %v3128_v28 }
 0x2b7   : > { %v3132_v47 = vadd.f32 %v1041_v30, %v1039_v46  ;;  %2358 = vrcp.f32 %v1033_v33 }
 0x2b9   : > { %2360 = vtanh.f32 %v3132_v47 }
 0x2c0   : > { %v2357_v3 = vpop.eup %2356 }
 0x2c1   : > { %v1046_v4 = vmul.f32 %v2357_v3, %v2355_v48  ;;  %v2359_v49 = vpop.eup %2358 }
 0x2c3   : > { %2023 = vst [vmem:[%s2940_s25 + $0x10] sm:$0xff] %v1046_v4  ;;  %v2361_v10 = vpop.eup %2360 }
 0x2c4   : > { %v1047_v50 = vmul.f32 %v2361_v10, %v2359_v49 }
 0x2c6   : > { %2024 = vst [vmem:[%s2940_s25 + $0x18] sm:$0xff] %v1047_v50  ;;  %v1064_v51 = vpack.c.bf16 %v1047_v50, %v1046_v4 }
 0x2c8   : > { %1290 = vmatmul.mubr.bf16.vlgmr.msra.gmra.mrb[8].mxu0 %v1064_v51  ;;  %1333 = vmatmul.mubr.bf16.vlgmr.msra.gmra.mrb[8].mxu1 %v1064_v51 }
 0x2c9   : > { %1609 = vmatpush1.bf16.msra.mxu0 %v2945_v5  ;;  %1652 = vmatpush1.bf16.msra.mxu1 %v2960_v11  ;;  %v2282_v5 = vld [vmem:[#allocation7 + $0x44] ss:$16 sps:$4 sm:$0xff]  }
 0x2ca   : > { %1610 = vmatprep.subr.bf16.mxu0 %v2950_v7  ;;  %1653 = vmatprep.subr.bf16.mxu1 %v2970_v14  ;;  %v2285_v7 = vld [vmem:[#allocation7 + $0x64] ss:$16 sps:$4 sm:$0xff]   ;;  %v2286_v14 = vld [vmem:[#allocation7 + $0x80] ss:$16 sps:$4 sm:$0xff]  }
 0x2cb   : > { %1640 = vmatprep.mubr.bf16.mxu0 %v2670_v6  ;;  %1683 = vmatprep.mubr.bf16.mxu1 %v2670_v6  ;;  %v2280_v6 = vld [vmem:[#allocation7 + $0x40] ss:$16 sps:$4 sm:$0xff]   ;;  %v2288_v11 = vld [vmem:[#allocation7 + $0x84] ss:$16 sps:$4 sm:$0xff]  }
 0x2cd   : > { %1611 = vmatpush1.bf16.msra.mxu0 %v2953_v8  ;;  %1654 = vmatpush1.bf16.msra.mxu1 %v2972_v15  ;;  %v2283_v8 = vld [vmem:[#allocation7 + $0x60] ss:$16 sps:$4 sm:$0xff]   ;;  %v2291_v15 = vld [vmem:[#allocation7 + $0xa4] ss:$16 sps:$4 sm:$0xff]  }
 0x2ce   : > { %1655 = vmatprep.subr.bf16.mxu1 %v2980_v18  ;;  %1612 = vmatprep.subr.bf16.mxu0 %v2282_v5  ;;  %v2289_v18 = vld [vmem:[#allocation7 + $0xa0] ss:$16 sps:$4 sm:$0xff]  }
 0x2d1   : > { %1656 = vmatpush1.bf16.msra.mxu1 %v2984_v19  ;;  %1613 = vmatpush1.bf16.msra.mxu0 %v2280_v6  ;;  %v2294_v19 = vld [vmem:[#allocation7 + $0xc4] ss:$16 sps:$4 sm:$0xff]  }
 0x2d2   : > { %1657 = vmatprep.subr.bf16.mxu1 %v2987_v20  ;;  %1614 = vmatprep.subr.bf16.mxu0 %v2285_v7  ;;  %v2292_v20 = vld [vmem:[#allocation7 + $0xc0] ss:$16 sps:$4 sm:$0xff]  }
 0x2d5   : > { %1658 = vmatpush1.bf16.msra.mxu1 %v2996_v23  ;;  %1615 = vmatpush1.bf16.msra.mxu0 %v2283_v8  ;;  %v2297_v23 = vld [vmem:[#allocation7 + $0xe4] ss:$16 sps:$4 sm:$0xff]  }
 0x2d6   : > { %1659 = vmatprep.subr.bf16.mxu1 %v2999_v24  ;;  %1616 = vmatprep.subr.bf16.mxu0 %v2288_v11  ;;  %v2295_v24 = vld [vmem:[#allocation7 + $0xe0] ss:$16 sps:$4 sm:$0xff]  }
 0x2d9   : > { %1660 = vmatpush1.bf16.msra.mxu1 %v3008_v27  ;;  %1617 = vmatpush1.bf16.msra.mxu0 %v2286_v14  ;;  %v2025_v27 = vld [vmem:[%s2925_s11 + $0x40] sm:$0xff] }
 0x2da   : > { %1661 = vmatprep.subr.bf16.mxu1 %v3013_v29  ;;  %1618 = vmatprep.subr.bf16.mxu0 %v2291_v15  ;;  %v2027_v29 = vld [vmem:[%s2925_s11 + $0x50] sm:$0xff] }
 0x2db   : > { %v1061_v34 = vunpack.c.h.bf16 %v2027_v29 }
 0x2dd   : > { %1662 = vmatpush1.bf16.msra.mxu1 %v3017_v31  ;;  %1619 = vmatpush1.bf16.msra.mxu0 %v2289_v18  ;;  %v1056_v31 = vunpack.c.l.bf16 %v2025_v27 }
 0x2de   : > { %1663 = vmatprep.subr.bf16.mxu1 %v3020_v32  ;;  %1620 = vmatprep.subr.bf16.mxu0 %v2294_v19  ;;  %v1057_v32 = vunpack.c.h.bf16 %v2025_v27 }
 0x2e1   : > { %1664 = vmatpush1.bf16.msra.mxu1 %v3030_v36  ;;  %1621 = vmatpush1.bf16.msra.mxu0 %v2292_v20  ;;  %v1060_v36 = vunpack.c.l.bf16 %v2027_v29 }
 0x2e2   : > { %1665 = vmatprep.subr.bf16.mxu1 %v3033_v37  ;;  %1622 = vmatprep.subr.bf16.mxu0 %v2297_v23 }
 0x2e5   : > { %1666 = vmatpush1.bf16.msra.mxu1 %v3037_v39  ;;  %1623 = vmatpush1.bf16.msra.mxu0 %v2295_v24 }
 0x39b   : > { %v1291_v37 = vpop.f32.mrb[8].mxu0  ;;  %v1334_v39 = vpop.f32.mrb[8].mxu1 }
 0x39c   : > { %v1343_v52 = vadd.f32 %v1291_v37, %v1056_v31  ;;  %v1293_v54 = vpop.f32.mrb[9].mxu0  ;;  %v1336_v55 = vpop.f32.mrb[9].mxu1  ;;  %v1345_v44 = vadd.f32 %v1334_v39, %v1058_v40  ;;  %v2069_v31 = vld [vmem:[%s2925_s11 + $0x60] sm:$0xff] }
 0x39d   : > { %v1344_v56 = vadd.f32 %v1293_v54, %v1057_v32  ;;  %v1295_v57 = vpop.f32.mrb[10].mxu0  ;;  %v1338_v58 = vpop.f32.mrb[10].mxu1  ;;  %v1346_v41 = vadd.f32 %v1336_v55, %v1059_v0  ;;  %v1407_v32 = vunpack.c.l.bf16 %v2069_v31  ;;  %v2070_v54 = vld [vmem:[%s2925_s11 + $0x68] sm:$0xff] }
 0x39e   : > { %v2061_v59 = vmul.f32 -1.442695, %v1343_v52  ;;  %v1347_v60 = vadd.f32 %v1295_v57, %v1060_v36  ;;  %v1297_v61 = vpop.f32.mrb[11].mxu0  ;;  %v1340_v62 = vpop.f32.mrb[11].mxu1  ;;  %v1349_v13 = vadd.f32 %v1338_v58, %v1062_v43  ;;  %v1408_v36 = vunpack.c.h.bf16 %v2069_v31 }
 0x39f   : > { %v2063_v63 = vmul.f32 -1.442695, %v1344_v56  ;;  %v1348_v1 = vadd.f32 %v1297_v61, %v1061_v34  ;;  %v2065_v9 = vmul.f32 -1.442695, %v1346_v41  ;;  %v1350_v12 = vadd.f32 %v1340_v62, %v1063_v42 }
 0x3a0   : > { %2362 = vpow2.f32 %v2061_v59  ;;  %v2062_v2 = vmul.f32 -1.442695, %v1347_v60  ;;  %v1409_v41 = vunpack.c.l.bf16 %v2070_v54 }
 0x3a1   : > { %2364 = vpow2.f32 %v2063_v63  ;;  %v2064_v38 = vmul.f32 -1.442695, %v1348_v1  ;;  %v2066_v22 = vmul.f32 -1.442695, %v1350_v12  ;;  %v1410_v1 = vunpack.c.h.bf16 %v2070_v54 }
 0x3a2   : > { %2366 = vpow2.f32 %v2062_v2 }
 0x3a3   : > { %2368 = vpow2.f32 %v2064_v38  ;;  %v2072_v38 = vld [vmem:[%s2925_s11 + $0x78] sm:$0xff] }
 0x3a4   : > { %2370 = vtanh.f32 %v1345_v44  ;;  %v1414_v43 = vunpack.c.h.bf16 %v2072_v38  ;;  %v1413_v44 = vunpack.c.l.bf16 %v2072_v38 }
 0x3a5   : > { %2372 = vpow2.f32 %v2065_v9 }
 0x3a6   : > { %2374 = vtanh.f32 %v1349_v13 }
 0x3aa   : > { %v2363_v16 = vpop.eup %2362 }
 0x3ab   : > { %v2365_v17 = vpop.eup %2364  ;;  %v1357_v21 = vadd.f32 1.0, %v2363_v16 }
 0x3ac   : > { %v1369_v25 = vadd.f32 1.0, %v2365_v17  ;;  %v2367_v26 = vpop.eup %2366 }
 0x3ad   : > { %2376 = vrcp.f32 %v1357_v21  ;;  %v1358_v30 = vadd.f32 1.0, %v2367_v26  ;;  %v2369_v45 = vpop.eup %2368 }
 0x3ae   : > { %2378 = vrcp.f32 %v1369_v25  ;;  %v1370_v33 = vadd.f32 1.0, %v2369_v45  ;;  %v2371_v46 = vpop.eup %2370 }
 0x3af   : > { %2380 = vpow2.f32 %v2066_v22  ;;  %v2373_v48 = vpop.eup %2372 }
 0x3b0   : > { %2382 = vrcp.f32 %v1358_v30  ;;  %v2375_v3 = vpop.eup %2374  ;;  %v1383_v50 = vadd.f32 1.0, %v2373_v48 }
 0x3b1   : > { %2384 = vrcp.f32 %v1370_v33 }
 0x3b2   : > { %2386 = vrcp.f32 %v1383_v50 }
 0x3b7   : > { %v2377_v4 = vpop.eup %2376 }
 0x3b8   : > { %v2379_v49 = vpop.eup %2378  ;;  %v1391_v10 = vmul.f32 %v2377_v4, %v2371_v46 }
 0x3b9   : > { %v2381_v51 = vpop.eup %2380  ;;  %v1389_v5 = vmul.f32 %v2379_v49, %v3128_v28 }
 0x3ba   : > { %v2383_v6 = vpop.eup %2382  ;;  %v1384_v14 = vadd.f32 1.0, %v2381_v51 }
 0x3bb   : > { %v3162_v7 = vadd.f32 %v1391_v10, %v1389_v5  ;;  %v1392_v8 = vmul.f32 %v2383_v6, %v2375_v3  ;;  %v2385_v11 = vpop.eup %2384 }
 0x3bc   : > { %v1390_v15 = vmul.f32 %v2385_v11, %v3132_v47  ;;  %v2387_v28 = vpop.eup %2386  ;;  %v2071_v47 = vld [vmem:[%s2925_s11 + $0x70] sm:$0xff] }
 0x3bd   : > { %2388 = vtanh.f32 %v3162_v7  ;;  %v1411_v37 = vunpack.c.l.bf16 %v2071_v47  ;;  %v1412_v52 = vunpack.c.h.bf16 %v2071_v47 }
 0x3be   : > { %v3166_v18 = vadd.f32 %v1392_v8, %v1390_v15  ;;  %2390 = vrcp.f32 %v1384_v14 }
 0x3c0   : > { %2392 = vtanh.f32 %v3166_v18 }
 0x3c7   : > { %v2389_v19 = vpop.eup %2388 }
 0x3c8   : > { %v1397_v20 = vmul.f32 %v2389_v19, %v2387_v28  ;;  %v2391_v23 = vpop.eup %2390 }
 0x3ca   : > { %2067 = vst [vmem:[%s2940_s25 + $0x20] sm:$0xff] %v1397_v20  ;;  %v2393_v24 = vpop.eup %2392 }
 0x3cb   : > { %v1398_v27 = vmul.f32 %v2393_v24, %v2391_v23 }
 0x3cd   : > { %2068 = vst [vmem:[%s2940_s25 + $0x28] sm:$0xff] %v1398_v27  ;;  %v1415_v29 = vpack.c.bf16 %v1398_v27, %v1397_v20 }
 0x3cf   : > { %1641 = vmatmul.mubr.bf16.vlgmr.msra.gmra.mrb[12].mxu0 %v1415_v29  ;;  %1684 = vmatmul.mubr.bf16.vlgmr.msra.gmra.mrb[12].mxu1 %v1415_v29 }
 0x4a2   : > { %v1642_v39 = vpop.f32.mrb[12].mxu0  ;;  %v1685_v34 = vpop.f32.mrb[12].mxu1 }
 0x4a3   : > { %v1694_v53 = vadd.f32 %v1642_v39, %v1407_v32  ;;  %v1644_v55 = vpop.f32.mrb[13].mxu0  ;;  %v1687_v56 = vpop.f32.mrb[13].mxu1  ;;  %v1696_v9 = vadd.f32 %v1685_v34, %v1409_v41 }
 0x4a4   : > { %v1695_v57 = vadd.f32 %v1644_v55, %v1408_v36  ;;  %v1646_v58 = vpop.f32.mrb[14].mxu0  ;;  %v1689_v59 = vpop.f32.mrb[14].mxu1  ;;  %v1697_v42 = vadd.f32 %v1687_v56, %v1410_v1 }
 0x4a5   : > { %v2105_v60 = vmul.f32 -1.442695, %v1694_v53  ;;  %v1698_v61 = vadd.f32 %v1646_v58, %v1411_v37  ;;  %v1648_v62 = vpop.f32.mrb[15].mxu0  ;;  %v1691_v63 = vpop.f32.mrb[15].mxu1  ;;  %v1700_v16 = vadd.f32 %v1689_v59, %v1413_v44 }
 0x4a6   : > { %v2107_v0 = vmul.f32 -1.442695, %v1695_v57  ;;  %v1699_v2 = vadd.f32 %v1648_v62, %v1412_v52  ;;  %v2109_v12 = vmul.f32 -1.442695, %v1697_v42  ;;  %v1701_v13 = vadd.f32 %v1691_v63, %v1414_v43 }
 0x4a7   : > { %2394 = vpow2.f32 %v2105_v60  ;;  %v2106_v35 = vmul.f32 -1.442695, %v1698_v61 }
 0x4a8   : > { %2396 = vpow2.f32 %v2107_v0  ;;  %v2108_v40 = vmul.f32 -1.442695, %v1699_v2  ;;  %v2110_v25 = vmul.f32 -1.442695, %v1701_v13 }
 0x4a9   : > { %2398 = vpow2.f32 %v2106_v35 }
 0x4aa   : > { %2400 = vpow2.f32 %v2108_v40 }
 0x4ab   : > { %2402 = vtanh.f32 %v1696_v9 }
 0x4ac   : > { %2404 = vpow2.f32 %v2109_v12 }
 0x4ad   : > { %2406 = vtanh.f32 %v1700_v16 }
 0x4b1   : > { %v2395_v17 = vpop.eup %2394 }
 0x4b2   : > { %v2397_v21 = vpop.eup %2396  ;;  %v1708_v22 = vadd.f32 1.0, %v2395_v17 }
 0x4b3   : > { %v1720_v26 = vadd.f32 1.0, %v2397_v21  ;;  %v2399_v30 = vpop.eup %2398 }
 0x4b4   : > { %2408 = vrcp.f32 %v1708_v22  ;;  %v1709_v45 = vadd.f32 1.0, %v2399_v30  ;;  %v2401_v33 = vpop.eup %2400 }
 0x4b5   : > { %2410 = vrcp.f32 %v1720_v26  ;;  %v1721_v46 = vadd.f32 1.0, %v2401_v33  ;;  %v2403_v48 = vpop.eup %2402 }
 0x4b6   : > { %2412 = vpow2.f32 %v2110_v25  ;;  %v2405_v3 = vpop.eup %2404 }
 0x4b7   : > { %2414 = vrcp.f32 %v1709_v45  ;;  %v2407_v4 = vpop.eup %2406  ;;  %v1734_v51 = vadd.f32 1.0, %v2405_v3 }
 0x4b8   : > { %2416 = vrcp.f32 %v1721_v46 }
 0x4b9   : > { %2418 = vrcp.f32 %v1734_v51 }
 0x4be   : > { %v2409_v49 = vpop.eup %2408 }
 0x4bf   : > { %v2411_v10 = vpop.eup %2410  ;;  %v1742_v50 = vmul.f32 %v2409_v49, %v2403_v48 }
 0x4c0   : > { %v2413_v5 = vpop.eup %2412  ;;  %v1740_v6 = vmul.f32 %v2411_v10, %v3162_v7 }
 0x4c1   : > { %v2415_v8 = vpop.eup %2414  ;;  %v1735_v28 = vadd.f32 1.0, %v2413_v5 }
 0x4c2   : > { %v1744_v11 = vadd.f32 %v1742_v50, %v1740_v6  ;;  %v1743_v14 = vmul.f32 %v2415_v8, %v2407_v4  ;;  %v2417_v15 = vpop.eup %2416 }
 0x4c3   : > { %v1741_v19 = vmul.f32 %v2417_v15, %v3166_v18 }
 0x4c4   : > { %2420 = vtanh.f32 %v1744_v11  ;;  %1755 = vst [vmem:[#allocation3] sm:$0xff] %v1744_v11  ;;  %1757 = vst [vmem:[#allocation13] sm:$0xff] %v1744_v11 }
 0x4c5   : > { %v1745_v20 = vadd.f32 %v1743_v14, %v1741_v19  ;;  %2422 = vrcp.f32 %v1735_v28 }
 0x4c7   : > { %2424 = vtanh.f32 %v1745_v20  ;;  %1756 = vst [vmem:[#allocation3 + $0x8] sm:$0xff] %v1745_v20  ;;  %1758 = vst [vmem:[#allocation13 + $0x8] sm:$0xff] %v1745_v20 }
 0x4c8   : > { %2553 = shalt.err (!%p2550_p8)
}
 0x4c9   : > { %s2554_s24 = scalar_lea.hbm %s3268_s5, 256 }
 0x4ca   : > { %p2555_p2 = scmp.ne.s32.totalorder %s3268_s5, %s2554_s24  ;;  %p2560_p7 = scmp.lt.u32.totalorder %s2554_s24, %s3268_s5 }
 0x4cc   : > { %p2556_p12 = pnand %p2555_p2, %p3296_p10 }
 0x4ce   : > { %p2557_p1 = pneg %p2556_p12 }
 0x4d0   : > { %p2562_p13 = pnand %p2560_p7, %p2557_p1 }
 0x4d2   : > { %2565 = shalt.err (!%p2562_p13)
}
 0x4d3   : > { %s2672_s15 = smov 128   ;;  %s2673_s17 = smov 8   ;;  %v2419_v7 = vpop.eup %2418 }
 0x4d4   : > { %2141 = dma.vmem_to_hbm [thread:$0]  (%p3296_p10), %s1793_s28, 256, %s3268_s5, [#allocation14], %s2672_s15, %s2672_s15, %s2673_s17   ;;  %v2421_v18 = vpop.eup %2420 }
 0x4d5   : > { %v1748_v23 = vmul.f32 %v2421_v18, %v2419_v7  ;;  %s2124_s26 = sshll.u32 %s2652_s21, 10  ;;  %s1776_s10 = sshll.u32 %s2940_s25, 4  ;;  %v2423_v24 = vpop.eup %2422  ;;  %s3206_s10 = int_to_ptr.vmem [resolvable:$true] %s1776_s10 }
 0x4d6   : > { %v2425_v27 = vpop.eup %2424  ;;  %s3204_s24 = scalar_lea.hbm %s3267_s4, %s2124_s26  ;;  %s1760_s28 = scalar_lea.sflag [#allocation6], %s2921_s8 }
 0x4d7   : > { %2111 = vst [vmem:[%s2940_s25 + $0x30] sm:$0xff] %v1748_v23  ;;  %1753 = vst [vmem:[#allocation2] sm:$0xff] %v1748_v23  ;;  %v1749_v29 = vmul.f32 %v2425_v27, %v2423_v24  ;;  %s2566_s21 = scalar_lea.vmem %s3206_s10, 1024  ;;  %s2674_s7 = smov [#allocation12]  }
 0x4d8   : > { %p2567_p6 = scmp.ne.s32.totalorder %s3206_s10, %s2566_s21  ;;  %s2570_s13 = sshll.u32 %s2674_s7, 4  ;;  %s2571_s13 = int_to_ptr.vmem [resolvable:$false] %s2570_s13 }
 0x4d9   : > { %2112 = vst [vmem:[%s2940_s25 + $0x38] sm:$0xff] %v1749_v29  ;;  %1754 = vst [vmem:[#allocation2 + $0x8] sm:$0xff] %v1749_v29  ;;  %s2572_s16 = scalar_lea.vmem %s2571_s13, 2048  ;;  %p2573_p9 = scmp.lt.s32.totalorder %s3206_s10, %s2571_s13 }
 0x4da   : > { %p2568_p11 = pnand %p2567_p6, %p2862_p3  ;;  %p2574_p0 = scmp.lt.s32.totalorder %s2572_s16, %s2566_s21 }
 0x4dc   : > { %p2569_p5 = pneg %p2568_p11  ;;  %p2575_p4 = por %p2574_p0, %p2573_p9 }
 0x4de   : > { %p2576_p8 = pnand %p2575_p4, %p2569_p5 }
 0x4e0   : > { %2579 = shalt.err (!%p2576_p8)
}
 0x4e1   : > { %s2580_s25 = scalar_lea.hbm %s3204_s24, 1024  ;;  %s2584_s30 = scalar_lea.hbm %s3267_s4, 2048 }
 0x4e2   : > { %p2581_p2 = scmp.ne.s32.totalorder %s3204_s24, %s2580_s25  ;;  %p2585_p7 = scmp.lt.u32.totalorder %s3204_s24, %s3267_s4 }
 0x4e3   : > { %p2586_p13 = scmp.lt.u32.totalorder %s2584_s30, %s2580_s25  ;;  %p2588_p11 = scmp.lt.u32.totalorder %s2580_s25, %s3204_s24 }
 0x4e4   : > { %p2582_p12 = pnand %p2581_p2, %p2862_p3 }
 0x4e5   : > { %p2587_p6 = por %p2586_p13, %p2585_p7 }
 0x4e6   : > { %p2583_p1 = pneg %p2582_p12 }
 0x4e7   : > { %p2589_p5 = por %p2588_p11, %p2587_p6 }
 0x4e9   : > { %p2590_p9 = pnand %p2589_p5, %p2583_p1 }
 0x4eb   : > { %2593 = shalt.err (!%p2590_p9)
}
 0x4ec   : > { %2139 = dma.vmem_to_hbm [thread:$0]  (%p2862_p3), %s3206_s10, 1024, %s3204_s24, %s1760_s28, %s2672_s15, %s2672_s15, %s2673_s17  }
 0x4ed   : > { %2631 = dma.done.wait (%p3296_p10), [#allocation14], 256  }
 0x4ee   : > { %2633 = vsyncadd (%p3296_p10), [#allocation14], 4294967040 }
 0x4ef PF: > { %s3297_s12 = sld [smem:[#allocation20_spill]]  ;;  %s1811_s21 = sand.u32 1, %s2640_s18  }
 0x4f0   : > { %p3299_p4 = scmp.ge.s32.totalorder %s2660_s23, 2  ;;  %s1812_s9 = scalar_lea.sflag [#allocation6], %s1811_s21 }
 0x4f5   : > { %p3298_p0 = scmp.ne.s32.totalorder %s3297_s12, 0 }
 0x4f7   : > { %p2160_p8 = pnand %p3299_p4, %p3298_p0 }
 0x4f9   : > { %2635 = dma.done.wait (!%p2160_p8), %s1812_s9, 1024  }
 0x4fa   : > { %2637 = vsyncadd (!%p2160_p8), %s1812_s9, 4294966272  ;;  %s25_s23 = sadd.s32 1, %s2660_s23   ;;  %s3300_s18 = smov %s2644_s19 }
 0x4fb   : > { %p22_p2 = scmp.ge.s32.totalorder %s25_s23, 4   ;;  %s3301_s19 = smov %s2648_s20 }
 0x4fc   : > { %s3302_s20 = smov %s2871_s14  ;;  %s3303_s21 = smov %s2656_s22 }
 0x4fd   : > { %s3304_s22 = smov %s3306_s1  ;;  %24 = sbr.rel (!%p22_p2) target bundleno = 11 (0xb), region = 114 }
 0x504   :  { %1817 = vsyncpa [#allocation5], 1 }
 0x505   :  { %1819 = vsyncpa [#allocation5 + $0x1], 1 }
 0x506   :  { %1820 = vsyncpa [#allocation8], 1 }
 0x507   :  { %1821 = vsyncpa [#allocation11], 1 }
 0x508   :  { %1822 = vsyncpa [#allocation6], 1 }
 0x509   :  { %1824 = vsyncpa [#allocation6 + $0x1], 1 }
 0x50a   :  { %1825 = vsyncpa [#allocation14], 1 }

</bundles_post_ra>
